<compile_context>
chip_gen: v7x
topology: tpu7x:2x2x1
jax: 0.10.0
libtpu: 0.0.40
codegen_flags: <defaults>
</compile_context>

<pallas_src>
import jax
import jax.numpy as jnp
from jax import lax
from jax.experimental import pallas as pl
from jax.experimental.pallas import tpu as pltpu


_VMEM_LIMIT = 32 * 1024 * 1024   # safe on v5e/v6e (128 MiB) and v7x (64 MiB)


# ---------------------------------------------------------------------------
# Fused kernel
# ---------------------------------------------------------------------------
def _aca_fused_kernel(H, W, C, Chid):
    WC = W * C

    def depthwise(pad_ref, x, wdt, b1t):
        """3x3 zero-padded depthwise conv (BN1 scale folded) + bias + ReLU.

        x:   (H, WC) f32, lane-dense (lane = w*C + c).
        wdt: (3, 3, WC) tiled depthwise weights; BN1 scale folded in and the
             W-edge wrap lanes already zeroed for the dw=0 / dw=2 taps.
        b1t: (1, WC) tiled BN1 bias.
        Row padding comes from the scratch's two zero border rows; the +/-1
        pixel column shift is a roll by C lanes (wrap killed by weight mask).
        """
        pad_ref[1:H + 1, :] = x
        acc = None
        for dh in range(3):
            rows = pad_ref[dh:dh + H, :]                               # (H, WC)
            t = rows * wdt[dh, 1]                                      # center
            acc = t if acc is None else acc + t
            acc = acc + pltpu.roll(rows, shift=C, axis=1) * wdt[dh, 0]       # w-1
            acc = acc + pltpu.roll(rows, shift=WC - C, axis=1) * wdt[dh, 2]  # w+1
        return jnp.maximum(acc + b1t, 0.0)

    def kernel(xu_ref, xm_ref, xd_ref,
               wdti_ref, b1ti_ref, wpi_ref, b2ti_ref,
               wdtc_ref, b1tc_ref, wpc_ref, b2tc_ref,
               gap_ref, ba1_ref, wpa_ref, ba2_ref,
               db_ref, bb1_ref, wpb_ref, bb2_ref, sct_ref,
               wdtk_ref, b1tk_ref, wpk_ref, b2tk_ref,
               out_ref, pad_ref, xm_scr):
        # Zero only the two padding border rows (interior is fully overwritten
        # by every depthwise() call; re-zero every step -> megacore safe).
        zrow = jnp.zeros((1, WC), jnp.float32)
        pad_ref[0:1, :] = zrow
        pad_ref[H + 1:H + 2, :] = zrow

        # ---- conv_inter(x_midd): DW+BN+ReLU, then block-diag PW+BN+ReLU ----
        h = depthwise(pad_ref, xm_ref[0], wdti_ref[...], b1ti_ref[...])
        xm = jnp.dot(h.astype(jnp.bfloat16), wpi_ref[...],
                     preferred_element_type=jnp.float32)
        xm_scr[...] = jnp.maximum(xm + b2ti_ref[...], 0.0)   # x_midd' stays in VMEM

        # ---- conv_compress over the (never materialized) concat -----------
        def comp_seg(k, seg):
            hk = depthwise(pad_ref, seg, wdtc_ref[k], b1tc_ref[k])
            return jnp.dot(hk.astype(jnp.bfloat16), wpc_ref[k],
                           preferred_element_type=jnp.float32)

        y = comp_seg(0, xu_ref[0]) + comp_seg(1, xm_scr[...]) + comp_seg(2, xd_ref[0])
        y = jnp.maximum(y + b2tc_ref[...], 0.0)               # x_compress (H, WC)

        # ---- GAP + Channel_weight SE MLP -----------------------------------
        # (On a 1x1 map the 3x3 depthwise conv is exactly its center tap; the
        #  tap, BN1 scale and 1/(H*W) are folded into gap_ref / db_ref.)
        s = jnp.sum(y, axis=0, keepdims=True)                               # (1, WC)
        g = jnp.dot(s, gap_ref[...], preferred_element_type=jnp.float32)    # (1, C)
        h1 = jnp.maximum(g + ba1_ref[...], 0.0)
        h2 = jnp.maximum(jnp.dot(h1, wpa_ref[...],
                                 preferred_element_type=jnp.float32) + ba2_ref[...], 0.0)
        # extra nn.ReLU() in Channel_weight is idempotent on ReLU'd values
        h3 = jnp.maximum(h2 * db_ref[...] + bb1_ref[...], 0.0)
        h4 = jnp.maximum(jnp.dot(h3, wpb_ref[...],
                                 preferred_element_type=jnp.float32) + bb2_ref[...], 0.0)
        w_ch = 1.0 / (1.0 + jnp.exp(-h4))                                   # (1, C)
        w_til = jnp.dot(w_ch, sct_ref[...],
                        preferred_element_type=jnp.float32)                 # (1, WC)

        # ---- fused weighted add + conv_cat ---------------------------------
        x_add = (xu_ref[0] + xd_ref[0]) * w_til

        def cat_seg(k, seg):
            hk = depthwise(pad_ref, seg, wdtk_ref[k], b1tk_ref[k])
            return jnp.dot(hk.astype(jnp.bfloat16), wpk_ref[k],
                           preferred_element_type=jnp.float32)

        o = cat_seg(0, x_add) + cat_seg(1, xm_scr[...])
        out_ref[0] = jnp.maximum(o + b2tk_ref[...], 0.0)      # lane-dense store

    return kernel


# ---------------------------------------------------------------------------
# Host-side parameter packing (hoisted out of the per-call path)
# ---------------------------------------------------------------------------
def _block_diag(wp, W):
    """(Cin, Cout) pointwise weight -> (W*Cin, W*Cout) block-diagonal matrix."""
    Cin, Cout = wp.shape
    eye = jnp.eye(W, dtype=wp.dtype)
    return (eye[:, None, :, None] * wp[None, :, None, :]).reshape(W * Cin, W * Cout)


def _fold_dsconv(p, W):
    """Fold one DSConv3x3 (eval-mode BN as scale/bias) into lane-dense operands."""
    Cin = p["wd"].shape[-1]
    WC = W * Cin
    wd = p["wd"] * p["s1"][0][None, None, :]                    # fold BN1 scale
    wdt = jnp.tile(wd, (1, 1, W))                               # (3, 3, W*Cin)
    lane = jnp.arange(WC)
    # kill wrap-around lanes of the +/-1 pixel (roll) taps via the weights
    wdt = wdt.at[:, 0, :].multiply((lane >= Cin).astype(wdt.dtype))
    wdt = wdt.at[:, 2, :].multiply((lane < WC - Cin).astype(wdt.dtype))
    b1t = jnp.tile(p["b1"], (1, W))                             # (1, W*Cin)
    wp = _block_diag(p["wp"], W) * jnp.tile(p["s2"], (1, W))    # fold BN2 scale
    b2t = jnp.tile(p["b2"], (1, W))                             # (1, W*Cout)
    return wdt, b1t, wp.astype(jnp.bfloat16), b2t


def _fold_dsconv_segments(p, W, C, nseg):
    """Split a DSConv over an n*C-channel concat into per-segment operands."""
    wdts, b1ts, wps = [], [], []
    b2t = None
    for k in range(nseg):
        sub = {"wd": p["wd"][:, :, k * C:(k + 1) * C],
               "s1": p["s1"][:, k * C:(k + 1) * C],
               "b1": p["b1"][:, k * C:(k + 1) * C],
               "wp": p["wp"][k * C:(k + 1) * C, :],
               "s2": p["s2"], "b2": p["b2"]}
        wdt, b1t, wp, b2t = _fold_dsconv(sub, W)
        wdts.append(wdt)
        b1ts.append(b1t)
        wps.append(wp)
    return jnp.stack(wdts), jnp.stack(b1ts), jnp.stack(wps), b2t


def prepare_kernel_params(params, H, W, in_channel, out_channel):
    """One-time packing of raw ACA_v3 params into fused-kernel operands."""
    if in_channel != out_channel:
        # TODO(synk): MaxPool2d(2, stride=2, ceil_mode=True) branch not implemented.
        raise NotImplementedError("pool branch (in_channel != out_channel) not implemented")
    C = out_channel
    pa, pb = params["cw_a"], params["cw_b"]

    wdt_i, b1t_i, wp_i, b2t_i = _fold_dsconv(params["conv_inter"], W)
    wdt_c, b1t_c, wp_c, b2t_c = _fold_dsconv_segments(params["conv_compress"], W, C, 3)
    wdt_k, b1t_k, wp_k, b2t_k = _fold_dsconv_segments(params["conv_cat"], W, C, 2)

    # GAP gather matrix (W*C, C): sums the W lane-groups per channel, with the
    # 1/(H*W) factor and cw_a's center depthwise tap * BN1 scale folded in.
    eye_tiled = jnp.tile(jnp.eye(C, dtype=jnp.float32), (W, 1))       # (W*C, C)
    d_a = pa["wd"][1, 1] * pa["s1"][0]
    gap = eye_tiled * (d_a / float(H * W))[None, :]
    # channel -> lane-dense scatter matrix (C, W*C) for broadcasting w_ch.
    sct = jnp.transpose(eye_tiled)

    return {
        "wdt_i": wdt_i, "b1t_i": b1t_i, "wp_i": wp_i, "b2t_i": b2t_i,
        "wdt_c": wdt_c, "b1t_c": b1t_c, "wp_c": wp_c, "b2t_c": b2t_c,
        "gap": gap, "ba1": pa["b1"], "wpa": pa["wp"] * pa["s2"], "ba2": pa["b2"],
        "db": (pb["wd"][1, 1] * pb["s1"][0])[None, :], "bb1": pb["b1"],
        "wpb": pb["wp"] * pb["s2"], "bb2": pb["b2"], "sct": sct,
        "wdt_k": wdt_k, "b1t_k": b1t_k, "wp_k": wp_k, "b2t_k": b2t_k,
    }


# ---------------------------------------------------------------------------
# Forward (inputs / outputs in PyTorch NCHW)
# ---------------------------------------------------------------------------
def aca_v3_forward(kparams, x_up, x_midd, x_down):
    B, C, H, W = x_up.shape
    if x_midd.shape[1] != C:
        raise NotImplementedError("pool branch (in_channel != out_channel) not implemented")
    WC = W * C
    Chid = kparams["wpa"].shape[1]

    # NCHW -> lane-dense (B, H, W*C).  TODO(synk): if the surrounding model is
    # kept NHWC/lane-dense these transposes disappear entirely.
    def pack(t):
        return jnp.transpose(t, (0, 2, 3, 1)).reshape(B, H, WC).astype(jnp.float32)

    xu, xm, xd = pack(x_up), pack(x_midd), pack(x_down)

    operands = (
        xu, xm, xd,
        kparams["wdt_i"], kparams["b1t_i"], kparams["wp_i"], kparams["b2t_i"],
        kparams["wdt_c"], kparams["b1t_c"], kparams["wp_c"], kparams["b2t_c"],
        kparams["gap"], kparams["ba1"], kparams["wpa"], kparams["ba2"],
        kparams["db"], kparams["bb1"], kparams["wpb"], kparams["bb2"], kparams["sct"],
        kparams["wdt_k"], kparams["b1t_k"], kparams["wp_k"], kparams["b2t_k"],
    )

    img_spec = pl.BlockSpec((1, H, WC), lambda b: (b, 0, 0))

    def _const_spec(shape):
        nd = len(shape)
        if nd == 2:
            return pl.BlockSpec(shape, lambda b: (0, 0))
        if nd == 3:
            return pl.BlockSpec(shape, lambda b: (0, 0, 0))
        return pl.BlockSpec(shape, lambda b: (0, 0, 0, 0))

    in_specs = [img_spec, img_spec, img_spec] + [_const_spec(a.shape) for a in operands[3:]]

    dw_flops = 6 * H * WC * 9 * 2
    pw_flops = 6 * 2 * H * WC * WC
    flops = int(B * (dw_flops + pw_flops))
    bytes_acc = int(4 * B * 4 * H * WC + 2 * 6 * WC * WC + 4 * 60 * WC)

    out = pl.pallas_call(
        _aca_fused_kernel(H, W, C, Chid),
        out_shape=jax.ShapeDtypeStruct((B, H, WC), jnp.float32),
        grid=(B,),
        in_specs=in_specs,
        out_specs=pl.BlockSpec((1, H, WC), lambda b: (b, 0, 0)),
        scratch_shapes=[
            pltpu.VMEM((H + 2, WC), jnp.float32),   # zero-border row-padding scratch
            pltpu.VMEM((H, WC), jnp.float32),       # x_midd' kept resident in VMEM
        ],
        compiler_params=pltpu.CompilerParams(
            dimension_semantics=("parallel",),
            vmem_limit_bytes=_VMEM_LIMIT),
        cost_estimate=pl.CostEstimate(flops=flops, transcendentals=int(B * C),
                                      bytes_accessed=bytes_acc),
    )(*operands)

    return jnp.transpose(out.reshape(B, H, W, C), (0, 3, 1, 2))   # back to NCHW


# ---------------------------------------------------------------------------
# Parameter init (deterministic; eval-mode BatchNorm folded into scale/bias)
# ---------------------------------------------------------------------------
def _init_dsconv(key, cin, cout):
    k = jax.random.split(key, 6)
    return {
        "wd": 0.2 * jax.random.normal(k[0], (3, 3, cin), jnp.float32),   # depthwise 3x3
        "s1": 1.0 + 0.1 * jax.random.normal(k[1], (1, cin), jnp.float32),
        "b1": 0.1 * jax.random.normal(k[2], (1, cin), jnp.float32),
        "wp": 0.2 * jax.random.normal(k[3], (cin, cout), jnp.float32),   # pointwise 1x1
        "s2": 1.0 + 0.1 * jax.random.normal(k[4], (1, cout), jnp.float32),
        "b2": 0.1 * jax.random.normal(k[5], (1, cout), jnp.float32),
    }


def init_aca_v3_params(key, in_channel, out_channel, hw):
    ks = jax.random.split(key, 5)
    return {
        "conv_inter": _init_dsconv(ks[0], in_channel, out_channel),
        "conv_compress": _init_dsconv(ks[1], 3 * out_channel, out_channel),
        "cw_a": _init_dsconv(ks[2], out_channel, out_channel // hw),
        "cw_b": _init_dsconv(ks[3], out_channel // hw, out_channel),
        "conv_cat": _init_dsconv(ks[4], 2 * out_channel, out_channel),
    }


# ---------------------------------------------------------------------------
# Pure-JAX reference for verification
# ---------------------------------------------------------------------------
def _ref_dsconv(x, p):
    cin = x.shape[-1]
    filt = p["wd"].reshape(3, 3, 1, cin)
    y = lax.conv_general_dilated(x, filt, (1, 1), "SAME",
                                 feature_group_count=cin,
                                 dimension_numbers=("NHWC", "HWIO", "NHWC"),
                                 precision=lax.Precision.HIGHEST)
    y = jnp.maximum(y * p["s1"][0] + p["b1"][0], 0.0)
    y = jnp.einsum("bhwc,cd->bhwd", y, p["wp"], precision=lax.Precision.HIGHEST)
    return jnp.maximum(y * p["s2"][0] + p["b2"][0], 0.0)


def _ref_forward(params, x_up, x_midd, x_down):
    to_nhwc = lambda t: jnp.transpose(t, (0, 2, 3, 1)).astype(jnp.float32)
    x_up, x_midd, x_down = map(to_nhwc, (x_up, x_midd, x_down))
    x_midd = _ref_dsconv(x_midd, params["conv_inter"])
    x_cat = jnp.concatenate([x_up, x_midd, x_down], axis=-1)
    x_compress = _ref_dsconv(x_cat, params["conv_compress"])
    g = jnp.mean(x_compress, axis=(1, 2), keepdims=True)
    h = _ref_dsconv(g, params["cw_a"])
    h = jnp.maximum(h, 0.0)
    h = _ref_dsconv(h, params["cw_b"])
    w_ch = jax.nn.sigmoid(h)
    x_add = (x_up + x_down) * w_ch
    x_cat2 = jnp.concatenate([x_add, x_midd], axis=-1)
    out = _ref_dsconv(x_cat2, params["conv_cat"])
    return jnp.transpose(out, (0, 3, 1, 2))


if __name__ == "__main__":
    B, Cin, Cout, H, W, hw = 2, 8, 8, 16, 16, 4
    key = jax.random.PRNGKey(0)
    kp_key, k1, k2, k3 = jax.random.split(key, 4)
    params = init_aca_v3_params(kp_key, Cin, Cout, hw)
    # Weight packing is hoisted out of the per-call path (done once).
    kparams = prepare_kernel_params(params, H, W, Cin, Cout)

    x_up = jax.random.normal(k1, (B, Cout, H, W), jnp.float32)
    x_midd = jax.random.normal(k2, (B, Cin, H, W), jnp.float32)
    x_down = jax.random.normal(k3, (B, Cout, H, W), jnp.float32)

    fwd = jax.jit(aca_v3_forward)
    out = jax.block_until_ready(fwd(kparams, x_up, x_midd, x_down))

    ref = jax.block_until_ready(_ref_forward(params, x_up, x_midd, x_down))
    assert out.shape == (B, Cout, H, W), out.shape
    max_err = float(jnp.max(jnp.abs(out - ref)))
    # Tolerance covers bf16 MXU operands (per perf guidance) vs the
    # HIGHEST-precision f32 reference.
    assert jnp.allclose(out, ref, rtol=3e-2, atol=3e-2), f"max abs err {max_err}"
    print("KERNEL_OK")
</pallas_src>

<mosaic_0001>
module attributes {stable_mosaic.version = 11 : i64} {
  func.func @kernel(%arg0: i32, %arg1: memref<1x16x128xf32, #tpu.memory_space<vmem>>, %arg2: memref<1x16x128xf32, #tpu.memory_space<vmem>>, %arg3: memref<1x16x128xf32, #tpu.memory_space<vmem>>, %arg4: memref<3x3x128xf32, #tpu.memory_space<vmem>>, %arg5: memref<1x128xf32, #tpu.memory_space<vmem>>, %arg6: memref<128x128xbf16, #tpu.memory_space<vmem>>, %arg7: memref<1x128xf32, #tpu.memory_space<vmem>>, %arg8: memref<3x3x3x128xf32, #tpu.memory_space<vmem>>, %arg9: memref<3x1x128xf32, #tpu.memory_space<vmem>>, %arg10: memref<3x128x128xbf16, #tpu.memory_space<vmem>>, %arg11: memref<1x128xf32, #tpu.memory_space<vmem>>, %arg12: memref<128x8xf32, #tpu.memory_space<vmem>>, %arg13: memref<1x8xf32, #tpu.memory_space<vmem>>, %arg14: memref<8x2xf32, #tpu.memory_space<vmem>>, %arg15: memref<1x2xf32, #tpu.memory_space<vmem>>, %arg16: memref<1x2xf32, #tpu.memory_space<vmem>>, %arg17: memref<1x2xf32, #tpu.memory_space<vmem>>, %arg18: memref<2x8xf32, #tpu.memory_space<vmem>>, %arg19: memref<1x8xf32, #tpu.memory_space<vmem>>, %arg20: memref<8x128xf32, #tpu.memory_space<vmem>>, %arg21: memref<2x3x3x128xf32, #tpu.memory_space<vmem>>, %arg22: memref<2x1x128xf32, #tpu.memory_space<vmem>>, %arg23: memref<2x128x128xbf16, #tpu.memory_space<vmem>>, %arg24: memref<1x128xf32, #tpu.memory_space<vmem>>, %arg25: memref<1x16x128xf32, #tpu.memory_space<vmem>>, %arg26: memref<18x128xf32, #tpu.memory_space<vmem>>, %arg27: memref<16x128xf32, #tpu.memory_space<vmem>>) attributes {dimension_semantics = [#tpu.dimension_semantics<parallel>], iteration_bounds = array<i64: 2>, scalar_prefetch = 0 : i64, scratch_operands = 2 : i64, tpu.core_type = #tpu.core_type<tc>, window_params = [{transform_indices = @transform_0, window_bounds = array<i64: 1, 16, 128>}, {transform_indices = @transform_1, window_bounds = array<i64: 1, 16, 128>}, {transform_indices = @transform_2, window_bounds = array<i64: 1, 16, 128>}, {pipeline_mode = #tpu.pipeline_mode<synchronous>, transform_indices = @transform_3, window_bounds = array<i64: 3, 3, 128>}, {pipeline_mode = #tpu.pipeline_mode<synchronous>, transform_indices = @transform_4, window_bounds = array<i64: 1, 128>}, {pipeline_mode = #tpu.pipeline_mode<synchronous>, transform_indices = @transform_5, window_bounds = array<i64: 128, 128>}, {pipeline_mode = #tpu.pipeline_mode<synchronous>, transform_indices = @transform_6, window_bounds = array<i64: 1, 128>}, {pipeline_mode = #tpu.pipeline_mode<synchronous>, transform_indices = @transform_7, window_bounds = array<i64: 3, 3, 3, 128>}, {pipeline_mode = #tpu.pipeline_mode<synchronous>, transform_indices = @transform_8, window_bounds = array<i64: 3, 1, 128>}, {pipeline_mode = #tpu.pipeline_mode<synchronous>, transform_indices = @transform_9, window_bounds = array<i64: 3, 128, 128>}, {pipeline_mode = #tpu.pipeline_mode<synchronous>, transform_indices = @transform_10, window_bounds = array<i64: 1, 128>}, {pipeline_mode = #tpu.pipeline_mode<synchronous>, transform_indices = @transform_11, window_bounds = array<i64: 128, 8>}, {pipeline_mode = #tpu.pipeline_mode<synchronous>, transform_indices = @transform_12, window_bounds = array<i64: 1, 8>}, {pipeline_mode = #tpu.pipeline_mode<synchronous>, transform_indices = @transform_13, window_bounds = array<i64: 8, 2>}, {pipeline_mode = #tpu.pipeline_mode<synchronous>, transform_indices = @transform_14, window_bounds = array<i64: 1, 2>}, {pipeline_mode = #tpu.pipeline_mode<synchronous>, transform_indices = @transform_15, window_bounds = array<i64: 1, 2>}, {pipeline_mode = #tpu.pipeline_mode<synchronous>, transform_indices = @transform_16, window_bounds = array<i64: 1, 2>}, {pipeline_mode = #tpu.pipeline_mode<synchronous>, transform_indices = @transform_17, window_bounds = array<i64: 2, 8>}, {pipeline_mode = #tpu.pipeline_mode<synchronous>, transform_indices = @transform_18, window_bounds = array<i64: 1, 8>}, {pipeline_mode = #tpu.pipeline_mode<synchronous>, transform_indices = @transform_19, window_bounds = array<i64: 8, 128>}, {pipeline_mode = #tpu.pipeline_mode<synchronous>, transform_indices = @transform_20, window_bounds = array<i64: 2, 3, 3, 128>}, {pipeline_mode = #tpu.pipeline_mode<synchronous>, transform_indices = @transform_21, window_bounds = array<i64: 2, 1, 128>}, {pipeline_mode = #tpu.pipeline_mode<synchronous>, transform_indices = @transform_22, window_bounds = array<i64: 2, 128, 128>}, {pipeline_mode = #tpu.pipeline_mode<synchronous>, transform_indices = @transform_23, window_bounds = array<i64: 1, 128>}, {transform_indices = @transform_24, window_bounds = array<i64: 1, 16, 128>}]} {
    %cst = arith.constant 0.000000e+00 : f32
    %0 = vector.broadcast %cst : f32 to vector<1x128xf32>
    %c0 = arith.constant 0 : index
    %c0_0 = arith.constant 0 : index
    %1 = vector.load %arg26[%c0, %c0_0] : memref<18x128xf32, #tpu.memory_space<vmem>>, vector<1x128xf32>
    tpu.vector_store %arg26[%c0, %c0_0], %0 {strides = array<i32>} : memref<18x128xf32, #tpu.memory_space<vmem>>, vector<1x128xf32>,
    %c17 = arith.constant 17 : index
    %c0_1 = arith.constant 0 : index
    %2 = vector.load %arg26[%c17, %c0_1] : memref<18x128xf32, #tpu.memory_space<vmem>>, vector<1x128xf32>
    tpu.vector_store %arg26[%c17, %c0_1], %0 {strides = array<i32>} : memref<18x128xf32, #tpu.memory_space<vmem>>, vector<1x128xf32>,
    %c0_2 = arith.constant 0 : index
    %c0_3 = arith.constant 0 : index
    %c0_4 = arith.constant 0 : index
    %3 = vector.load %arg2[%c0_2, %c0_3, %c0_4] : memref<1x16x128xf32, #tpu.memory_space<vmem>>, vector<1x16x128xf32>
    %4 = vector.shape_cast %3 : vector<1x16x128xf32> to vector<16x128xf32>
    %c0_5 = arith.constant 0 : index
    %c0_6 = arith.constant 0 : index
    %c0_7 = arith.constant 0 : index
    %5 = vector.load %arg4[%c0_5, %c0_6, %c0_7] : memref<3x3x128xf32, #tpu.memory_space<vmem>>, vector<3x3x128xf32>
    %c0_8 = arith.constant 0 : index
    %c0_9 = arith.constant 0 : index
    %6 = vector.load %arg5[%c0_8, %c0_9] : memref<1x128xf32, #tpu.memory_space<vmem>>, vector<1x128xf32>
    %c1 = arith.constant 1 : index
    %c0_10 = arith.constant 0 : index
    %7 = vector.load %arg26[%c1, %c0_10] : memref<18x128xf32, #tpu.memory_space<vmem>>, vector<16x128xf32>
    tpu.vector_store %arg26[%c1, %c0_10], %4 {strides = array<i32>} : memref<18x128xf32, #tpu.memory_space<vmem>>, vector<16x128xf32>,
    %c0_11 = arith.constant 0 : index
    %c0_12 = arith.constant 0 : index
    %8 = vector.load %arg26[%c0_11, %c0_12] : memref<18x128xf32, #tpu.memory_space<vmem>>, vector<16x128xf32>
    %9 = vector.extract_strided_slice %5 {offsets = [0, 1, 0], sizes = [1, 1, 128], strides = [1, 1, 1]} : vector<3x3x128xf32> to vector<1x1x128xf32>
    %10 = vector.shape_cast %9 : vector<1x1x128xf32> to vector<128xf32>
    %11 = vector.shape_cast %10 : vector<128xf32> to vector<1x128xf32>
    %12 = vector.broadcast %11 : vector<1x128xf32> to vector<16x128xf32>
    %13 = arith.mulf %8, %12 : vector<16x128xf32>
    %c8_i32 = arith.constant 8 : i32
    %14 = tpu.dynamic_rotate %8 by %c8_i32 dim 1 : vector<16x128xf32>, i32 -> vector<16x128xf32>
    %15 = vector.extract_strided_slice %5 {offsets = [0, 0, 0], sizes = [1, 1, 128], strides = [1, 1, 1]} : vector<3x3x128xf32> to vector<1x1x128xf32>
    %16 = vector.shape_cast %15 : vector<1x1x128xf32> to vector<128xf32>
    %17 = vector.shape_cast %16 : vector<128xf32> to vector<1x128xf32>
    %18 = vector.broadcast %17 : vector<1x128xf32> to vector<16x128xf32>
    %19 = arith.mulf %14, %18 : vector<16x128xf32>
    %20 = arith.addf %13, %19 : vector<16x128xf32>
    %c120_i32 = arith.constant 120 : i32
    %21 = tpu.dynamic_rotate %8 by %c120_i32 dim 1 : vector<16x128xf32>, i32 -> vector<16x128xf32>
    %22 = vector.extract_strided_slice %5 {offsets = [0, 2, 0], sizes = [1, 1, 128], strides = [1, 1, 1]} : vector<3x3x128xf32> to vector<1x1x128xf32>
    %23 = vector.shape_cast %22 : vector<1x1x128xf32> to vector<128xf32>
    %24 = vector.shape_cast %23 : vector<128xf32> to vector<1x128xf32>
    %25 = vector.broadcast %24 : vector<1x128xf32> to vector<16x128xf32>
    %26 = arith.mulf %21, %25 : vector<16x128xf32>
    %27 = arith.addf %20, %26 : vector<16x128xf32>
    %c1_13 = arith.constant 1 : index
    %c0_14 = arith.constant 0 : index
    %28 = vector.load %arg26[%c1_13, %c0_14] : memref<18x128xf32, #tpu.memory_space<vmem>>, vector<16x128xf32>
    %29 = vector.extract_strided_slice %5 {offsets = [1, 1, 0], sizes = [1, 1, 128], strides = [1, 1, 1]} : vector<3x3x128xf32> to vector<1x1x128xf32>
    %30 = vector.shape_cast %29 : vector<1x1x128xf32> to vector<128xf32>
    %31 = vector.shape_cast %30 : vector<128xf32> to vector<1x128xf32>
    %32 = vector.broadcast %31 : vector<1x128xf32> to vector<16x128xf32>
    %33 = arith.mulf %28, %32 : vector<16x128xf32>
    %34 = arith.addf %27, %33 : vector<16x128xf32>
    %c8_i32_15 = arith.constant 8 : i32
    %35 = tpu.dynamic_rotate %28 by %c8_i32_15 dim 1 : vector<16x128xf32>, i32 -> vector<16x128xf32>
    %36 = vector.extract_strided_slice %5 {offsets = [1, 0, 0], sizes = [1, 1, 128], strides = [1, 1, 1]} : vector<3x3x128xf32> to vector<1x1x128xf32>
    %37 = vector.shape_cast %36 : vector<1x1x128xf32> to vector<128xf32>
    %38 = vector.shape_cast %37 : vector<128xf32> to vector<1x128xf32>
    %39 = vector.broadcast %38 : vector<1x128xf32> to vector<16x128xf32>
    %40 = arith.mulf %35, %39 : vector<16x128xf32>
    %41 = arith.addf %34, %40 : vector<16x128xf32>
    %c120_i32_16 = arith.constant 120 : i32
    %42 = tpu.dynamic_rotate %28 by %c120_i32_16 dim 1 : vector<16x128xf32>, i32 -> vector<16x128xf32>
    %43 = vector.extract_strided_slice %5 {offsets = [1, 2, 0], sizes = [1, 1, 128], strides = [1, 1, 1]} : vector<3x3x128xf32> to vector<1x1x128xf32>
    %44 = vector.shape_cast %43 : vector<1x1x128xf32> to vector<128xf32>
    %45 = vector.shape_cast %44 : vector<128xf32> to vector<1x128xf32>
    %46 = vector.broadcast %45 : vector<1x128xf32> to vector<16x128xf32>
    %47 = arith.mulf %42, %46 : vector<16x128xf32>
    %48 = arith.addf %41, %47 : vector<16x128xf32>
    %c2 = arith.constant 2 : index
    %c0_17 = arith.constant 0 : index
    %49 = vector.load %arg26[%c2, %c0_17] : memref<18x128xf32, #tpu.memory_space<vmem>>, vector<16x128xf32>
    %50 = vector.extract_strided_slice %5 {offsets = [2, 1, 0], sizes = [1, 1, 128], strides = [1, 1, 1]} : vector<3x3x128xf32> to vector<1x1x128xf32>
    %51 = vector.shape_cast %50 : vector<1x1x128xf32> to vector<128xf32>
    %52 = vector.shape_cast %51 : vector<128xf32> to vector<1x128xf32>
    %53 = vector.broadcast %52 : vector<1x128xf32> to vector<16x128xf32>
    %54 = arith.mulf %49, %53 : vector<16x128xf32>
    %55 = arith.addf %48, %54 : vector<16x128xf32>
    %c8_i32_18 = arith.constant 8 : i32
    %56 = tpu.dynamic_rotate %49 by %c8_i32_18 dim 1 : vector<16x128xf32>, i32 -> vector<16x128xf32>
    %57 = vector.extract_strided_slice %5 {offsets = [2, 0, 0], sizes = [1, 1, 128], strides = [1, 1, 1]} : vector<3x3x128xf32> to vector<1x1x128xf32>
    %58 = vector.shape_cast %57 : vector<1x1x128xf32> to vector<128xf32>
    %59 = vector.shape_cast %58 : vector<128xf32> to vector<1x128xf32>
    %60 = vector.broadcast %59 : vector<1x128xf32> to vector<16x128xf32>
    %61 = arith.mulf %56, %60 : vector<16x128xf32>
    %62 = arith.addf %55, %61 : vector<16x128xf32>
    %c120_i32_19 = arith.constant 120 : i32
    %63 = tpu.dynamic_rotate %49 by %c120_i32_19 dim 1 : vector<16x128xf32>, i32 -> vector<16x128xf32>
    %64 = vector.extract_strided_slice %5 {offsets = [2, 2, 0], sizes = [1, 1, 128], strides = [1, 1, 1]} : vector<3x3x128xf32> to vector<1x1x128xf32>
    %65 = vector.shape_cast %64 : vector<1x1x128xf32> to vector<128xf32>
    %66 = vector.shape_cast %65 : vector<128xf32> to vector<1x128xf32>
    %67 = vector.broadcast %66 : vector<1x128xf32> to vector<16x128xf32>
    %68 = arith.mulf %63, %67 : vector<16x128xf32>
    %69 = arith.addf %62, %68 : vector<16x128xf32>
    %70 = vector.broadcast %6 : vector<1x128xf32> to vector<16x128xf32>
    %71 = arith.addf %69, %70 : vector<16x128xf32>
    %cst_20 = arith.constant 0.000000e+00 : f32
    %72 = vector.broadcast %cst_20 : f32 to vector<16x128xf32>
    %73 = arith.maximumf %71, %72 : vector<16x128xf32>
    %74 = arith.truncf %73 : vector<16x128xf32> to vector<16x128xbf16>
    %c0_21 = arith.constant 0 : index
    %c0_22 = arith.constant 0 : index
    %75 = vector.load %arg6[%c0_21, %c0_22] : memref<128x128xbf16, #tpu.memory_space<vmem>>, vector<128x128xbf16>
    %cst_23 = arith.constant dense<0.000000e+00> : vector<16x128xf32>
    %76 = tpu.matmul %74, %75, %cst_23 {dimension_numbers = #tpu.dot_dimension_numbers<[1], [0], [0], [1], [0, 0, 1, 1], [], []>} : vector<16x128xbf16>, vector<128x128xbf16>, vector<16x128xf32> -> vector<16x128xf32>
    %c0_24 = arith.constant 0 : index
    %c0_25 = arith.constant 0 : index
    %77 = vector.load %arg7[%c0_24, %c0_25] : memref<1x128xf32, #tpu.memory_space<vmem>>, vector<1x128xf32>
    %78 = vector.broadcast %77 : vector<1x128xf32> to vector<16x128xf32>
    %79 = arith.addf %76, %78 : vector<16x128xf32>
    %cst_26 = arith.constant 0.000000e+00 : f32
    %80 = vector.broadcast %cst_26 : f32 to vector<16x128xf32>
    %81 = arith.maximumf %79, %80 : vector<16x128xf32>
    %c0_27 = arith.constant 0 : index
    %c0_28 = arith.constant 0 : index
    %82 = vector.load %arg27[%c0_27, %c0_28] : memref<16x128xf32, #tpu.memory_space<vmem>>, vector<16x128xf32>
    tpu.vector_store %arg27[%c0_27, %c0_28], %81 {strides = array<i32>} : memref<16x128xf32, #tpu.memory_space<vmem>>, vector<16x128xf32>,
    %c0_29 = arith.constant 0 : index
    %c0_30 = arith.constant 0 : index
    %c0_31 = arith.constant 0 : index
    %83 = vector.load %arg1[%c0_29, %c0_30, %c0_31] : memref<1x16x128xf32, #tpu.memory_space<vmem>>, vector<1x16x128xf32>
    %84 = vector.shape_cast %83 : vector<1x16x128xf32> to vector<16x128xf32>
    %c0_32 = arith.constant 0 : index
    %c0_33 = arith.constant 0 : index
    %c0_34 = arith.constant 0 : index
    %c0_35 = arith.constant 0 : index
    %85 = vector.load %arg8[%c0_32, %c0_33, %c0_34, %c0_35] : memref<3x3x3x128xf32, #tpu.memory_space<vmem>>, vector<1x3x3x128xf32>
    %86 = vector.shape_cast %85 : vector<1x3x3x128xf32> to vector<3x3x128xf32>
    %c0_36 = arith.constant 0 : index
    %c0_37 = arith.constant 0 : index
    %c0_38 = arith.constant 0 : index
    %87 = vector.load %arg9[%c0_36, %c0_37, %c0_38] : memref<3x1x128xf32, #tpu.memory_space<vmem>>, vector<1x1x128xf32>
    %88 = vector.shape_cast %87 : vector<1x1x128xf32> to vector<1x128xf32>
    %c1_39 = arith.constant 1 : index
    %c0_40 = arith.constant 0 : index
    %89 = vector.load %arg26[%c1_39, %c0_40] : memref<18x128xf32, #tpu.memory_space<vmem>>, vector<16x128xf32>
    tpu.vector_store %arg26[%c1_39, %c0_40], %84 {strides = array<i32>} : memref<18x128xf32, #tpu.memory_space<vmem>>, vector<16x128xf32>,
    %c0_41 = arith.constant 0 : index
    %c0_42 = arith.constant 0 : index
    %90 = vector.load %arg26[%c0_41, %c0_42] : memref<18x128xf32, #tpu.memory_space<vmem>>, vector<16x128xf32>
    %91 = vector.extract_strided_slice %86 {offsets = [0, 1, 0], sizes = [1, 1, 128], strides = [1, 1, 1]} : vector<3x3x128xf32> to vector<1x1x128xf32>
    %92 = vector.shape_cast %91 : vector<1x1x128xf32> to vector<128xf32>
    %93 = vector.shape_cast %92 : vector<128xf32> to vector<1x128xf32>
    %94 = vector.broadcast %93 : vector<1x128xf32> to vector<16x128xf32>
    %95 = arith.mulf %90, %94 : vector<16x128xf32>
    %c8_i32_43 = arith.constant 8 : i32
    %96 = tpu.dynamic_rotate %90 by %c8_i32_43 dim 1 : vector<16x128xf32>, i32 -> vector<16x128xf32>
    %97 = vector.extract_strided_slice %86 {offsets = [0, 0, 0], sizes = [1, 1, 128], strides = [1, 1, 1]} : vector<3x3x128xf32> to vector<1x1x128xf32>
    %98 = vector.shape_cast %97 : vector<1x1x128xf32> to vector<128xf32>
    %99 = vector.shape_cast %98 : vector<128xf32> to vector<1x128xf32>
    %100 = vector.broadcast %99 : vector<1x128xf32> to vector<16x128xf32>
    %101 = arith.mulf %96, %100 : vector<16x128xf32>
    %102 = arith.addf %95, %101 : vector<16x128xf32>
    %c120_i32_44 = arith.constant 120 : i32
    %103 = tpu.dynamic_rotate %90 by %c120_i32_44 dim 1 : vector<16x128xf32>, i32 -> vector<16x128xf32>
    %104 = vector.extract_strided_slice %86 {offsets = [0, 2, 0], sizes = [1, 1, 128], strides = [1, 1, 1]} : vector<3x3x128xf32> to vector<1x1x128xf32>
    %105 = vector.shape_cast %104 : vector<1x1x128xf32> to vector<128xf32>
    %106 = vector.shape_cast %105 : vector<128xf32> to vector<1x128xf32>
    %107 = vector.broadcast %106 : vector<1x128xf32> to vector<16x128xf32>
    %108 = arith.mulf %103, %107 : vector<16x128xf32>
    %109 = arith.addf %102, %108 : vector<16x128xf32>
    %c1_45 = arith.constant 1 : index
    %c0_46 = arith.constant 0 : index
    %110 = vector.load %arg26[%c1_45, %c0_46] : memref<18x128xf32, #tpu.memory_space<vmem>>, vector<16x128xf32>
    %111 = vector.extract_strided_slice %86 {offsets = [1, 1, 0], sizes = [1, 1, 128], strides = [1, 1, 1]} : vector<3x3x128xf32> to vector<1x1x128xf32>
    %112 = vector.shape_cast %111 : vector<1x1x128xf32> to vector<128xf32>
    %113 = vector.shape_cast %112 : vector<128xf32> to vector<1x128xf32>
    %114 = vector.broadcast %113 : vector<1x128xf32> to vector<16x128xf32>
    %115 = arith.mulf %110, %114 : vector<16x128xf32>
    %116 = arith.addf %109, %115 : vector<16x128xf32>
    %c8_i32_47 = arith.constant 8 : i32
    %117 = tpu.dynamic_rotate %110 by %c8_i32_47 dim 1 : vector<16x128xf32>, i32 -> vector<16x128xf32>
    %118 = vector.extract_strided_slice %86 {offsets = [1, 0, 0], sizes = [1, 1, 128], strides = [1, 1, 1]} : vector<3x3x128xf32> to vector<1x1x128xf32>
    %119 = vector.shape_cast %118 : vector<1x1x128xf32> to vector<128xf32>
    %120 = vector.shape_cast %119 : vector<128xf32> to vector<1x128xf32>
    %121 = vector.broadcast %120 : vector<1x128xf32> to vector<16x128xf32>
    %122 = arith.mulf %117, %121 : vector<16x128xf32>
    %123 = arith.addf %116, %122 : vector<16x128xf32>
    %c120_i32_48 = arith.constant 120 : i32
    %124 = tpu.dynamic_rotate %110 by %c120_i32_48 dim 1 : vector<16x128xf32>, i32 -> vector<16x128xf32>
    %125 = vector.extract_strided_slice %86 {offsets = [1, 2, 0], sizes = [1, 1, 128], strides = [1, 1, 1]} : vector<3x3x128xf32> to vector<1x1x128xf32>
    %126 = vector.shape_cast %125 : vector<1x1x128xf32> to vector<128xf32>
    %127 = vector.shape_cast %126 : vector<128xf32> to vector<1x128xf32>
    %128 = vector.broadcast %127 : vector<1x128xf32> to vector<16x128xf32>
    %129 = arith.mulf %124, %128 : vector<16x128xf32>
    %130 = arith.addf %123, %129 : vector<16x128xf32>
    %c2_49 = arith.constant 2 : index
    %c0_50 = arith.constant 0 : index
    %131 = vector.load %arg26[%c2_49, %c0_50] : memref<18x128xf32, #tpu.memory_space<vmem>>, vector<16x128xf32>
    %132 = vector.extract_strided_slice %86 {offsets = [2, 1, 0], sizes = [1, 1, 128], strides = [1, 1, 1]} : vector<3x3x128xf32> to vector<1x1x128xf32>
    %133 = vector.shape_cast %132 : vector<1x1x128xf32> to vector<128xf32>
    %134 = vector.shape_cast %133 : vector<128xf32> to vector<1x128xf32>
    %135 = vector.broadcast %134 : vector<1x128xf32> to vector<16x128xf32>
    %136 = arith.mulf %131, %135 : vector<16x128xf32>
    %137 = arith.addf %130, %136 : vector<16x128xf32>
    %c8_i32_51 = arith.constant 8 : i32
    %138 = tpu.dynamic_rotate %131 by %c8_i32_51 dim 1 : vector<16x128xf32>, i32 -> vector<16x128xf32>
    %139 = vector.extract_strided_slice %86 {offsets = [2, 0, 0], sizes = [1, 1, 128], strides = [1, 1, 1]} : vector<3x3x128xf32> to vector<1x1x128xf32>
    %140 = vector.shape_cast %139 : vector<1x1x128xf32> to vector<128xf32>
    %141 = vector.shape_cast %140 : vector<128xf32> to vector<1x128xf32>
    %142 = vector.broadcast %141 : vector<1x128xf32> to vector<16x128xf32>
    %143 = arith.mulf %138, %142 : vector<16x128xf32>
    %144 = arith.addf %137, %143 : vector<16x128xf32>
    %c120_i32_52 = arith.constant 120 : i32
    %145 = tpu.dynamic_rotate %131 by %c120_i32_52 dim 1 : vector<16x128xf32>, i32 -> vector<16x128xf32>
    %146 = vector.extract_strided_slice %86 {offsets = [2, 2, 0], sizes = [1, 1, 128], strides = [1, 1, 1]} : vector<3x3x128xf32> to vector<1x1x128xf32>
    %147 = vector.shape_cast %146 : vector<1x1x128xf32> to vector<128xf32>
    %148 = vector.shape_cast %147 : vector<128xf32> to vector<1x128xf32>
    %149 = vector.broadcast %148 : vector<1x128xf32> to vector<16x128xf32>
    %150 = arith.mulf %145, %149 : vector<16x128xf32>
    %151 = arith.addf %144, %150 : vector<16x128xf32>
    %152 = vector.broadcast %88 : vector<1x128xf32> to vector<16x128xf32>
    %153 = arith.addf %151, %152 : vector<16x128xf32>
    %cst_53 = arith.constant 0.000000e+00 : f32
    %154 = vector.broadcast %cst_53 : f32 to vector<16x128xf32>
    %155 = arith.maximumf %153, %154 : vector<16x128xf32>
    %156 = arith.truncf %155 : vector<16x128xf32> to vector<16x128xbf16>
    %c0_54 = arith.constant 0 : index
    %c0_55 = arith.constant 0 : index
    %c0_56 = arith.constant 0 : index
    %157 = vector.load %arg10[%c0_54, %c0_55, %c0_56] : memref<3x128x128xbf16, #tpu.memory_space<vmem>>, vector<1x128x128xbf16>
    %158 = vector.shape_cast %157 : vector<1x128x128xbf16> to vector<128x128xbf16>
    %cst_57 = arith.constant dense<0.000000e+00> : vector<16x128xf32>
    %159 = tpu.matmul %156, %158, %cst_57 {dimension_numbers = #tpu.dot_dimension_numbers<[1], [0], [0], [1], [0, 0, 1, 1], [], []>} : vector<16x128xbf16>, vector<128x128xbf16>, vector<16x128xf32> -> vector<16x128xf32>
    %c0_58 = arith.constant 0 : index
    %c0_59 = arith.constant 0 : index
    %160 = vector.load %arg27[%c0_58, %c0_59] : memref<16x128xf32, #tpu.memory_space<vmem>>, vector<16x128xf32>
    %c1_60 = arith.constant 1 : index
    %c0_61 = arith.constant 0 : index
    %c0_62 = arith.constant 0 : index
    %c0_63 = arith.constant 0 : index
    %161 = vector.load %arg8[%c1_60, %c0_61, %c0_62, %c0_63] : memref<3x3x3x128xf32, #tpu.memory_space<vmem>>, vector<1x3x3x128xf32>
    %162 = vector.shape_cast %161 : vector<1x3x3x128xf32> to vector<3x3x128xf32>
    %c1_64 = arith.constant 1 : index
    %c0_65 = arith.constant 0 : index
    %c0_66 = arith.constant 0 : index
    %163 = vector.load %arg9[%c1_64, %c0_65, %c0_66] : memref<3x1x128xf32, #tpu.memory_space<vmem>>, vector<1x1x128xf32>
    %164 = vector.shape_cast %163 : vector<1x1x128xf32> to vector<1x128xf32>
    %c1_67 = arith.constant 1 : index
    %c0_68 = arith.constant 0 : index
    %165 = vector.load %arg26[%c1_67, %c0_68] : memref<18x128xf32, #tpu.memory_space<vmem>>, vector<16x128xf32>
    tpu.vector_store %arg26[%c1_67, %c0_68], %160 {strides = array<i32>} : memref<18x128xf32, #tpu.memory_space<vmem>>, vector<16x128xf32>,
    %c0_69 = arith.constant 0 : index
    %c0_70 = arith.constant 0 : index
    %166 = vector.load %arg26[%c0_69, %c0_70] : memref<18x128xf32, #tpu.memory_space<vmem>>, vector<16x128xf32>
    %167 = vector.extract_strided_slice %162 {offsets = [0, 1, 0], sizes = [1, 1, 128], strides = [1, 1, 1]} : vector<3x3x128xf32> to vector<1x1x128xf32>
    %168 = vector.shape_cast %167 : vector<1x1x128xf32> to vector<128xf32>
    %169 = vector.shape_cast %168 : vector<128xf32> to vector<1x128xf32>
    %170 = vector.broadcast %169 : vector<1x128xf32> to vector<16x128xf32>
    %171 = arith.mulf %166, %170 : vector<16x128xf32>
    %c8_i32_71 = arith.constant 8 : i32
    %172 = tpu.dynamic_rotate %166 by %c8_i32_71 dim 1 : vector<16x128xf32>, i32 -> vector<16x128xf32>
    %173 = vector.extract_strided_slice %162 {offsets = [0, 0, 0], sizes = [1, 1, 128], strides = [1, 1, 1]} : vector<3x3x128xf32> to vector<1x1x128xf32>
    %174 = vector.shape_cast %173 : vector<1x1x128xf32> to vector<128xf32>
    %175 = vector.shape_cast %174 : vector<128xf32> to vector<1x128xf32>
    %176 = vector.broadcast %175 : vector<1x128xf32> to vector<16x128xf32>
    %177 = arith.mulf %172, %176 : vector<16x128xf32>
    %178 = arith.addf %171, %177 : vector<16x128xf32>
    %c120_i32_72 = arith.constant 120 : i32
    %179 = tpu.dynamic_rotate %166 by %c120_i32_72 dim 1 : vector<16x128xf32>, i32 -> vector<16x128xf32>
    %180 = vector.extract_strided_slice %162 {offsets = [0, 2, 0], sizes = [1, 1, 128], strides = [1, 1, 1]} : vector<3x3x128xf32> to vector<1x1x128xf32>
    %181 = vector.shape_cast %180 : vector<1x1x128xf32> to vector<128xf32>
    %182 = vector.shape_cast %181 : vector<128xf32> to vector<1x128xf32>
    %183 = vector.broadcast %182 : vector<1x128xf32> to vector<16x128xf32>
    %184 = arith.mulf %179, %183 : vector<16x128xf32>
    %185 = arith.addf %178, %184 : vector<16x128xf32>
    %c1_73 = arith.constant 1 : index
    %c0_74 = arith.constant 0 : index
    %186 = vector.load %arg26[%c1_73, %c0_74] : memref<18x128xf32, #tpu.memory_space<vmem>>, vector<16x128xf32>
    %187 = vector.extract_strided_slice %162 {offsets = [1, 1, 0], sizes = [1, 1, 128], strides = [1, 1, 1]} : vector<3x3x128xf32> to vector<1x1x128xf32>
    %188 = vector.shape_cast %187 : vector<1x1x128xf32> to vector<128xf32>
    %189 = vector.shape_cast %188 : vector<128xf32> to vector<1x128xf32>
    %190 = vector.broadcast %189 : vector<1x128xf32> to vector<16x128xf32>
    %191 = arith.mulf %186, %190 : vector<16x128xf32>
    %192 = arith.addf %185, %191 : vector<16x128xf32>
    %c8_i32_75 = arith.constant 8 : i32
    %193 = tpu.dynamic_rotate %186 by %c8_i32_75 dim 1 : vector<16x128xf32>, i32 -> vector<16x128xf32>
    %194 = vector.extract_strided_slice %162 {offsets = [1, 0, 0], sizes = [1, 1, 128], strides = [1, 1, 1]} : vector<3x3x128xf32> to vector<1x1x128xf32>
    %195 = vector.shape_cast %194 : vector<1x1x128xf32> to vector<128xf32>
    %196 = vector.shape_cast %195 : vector<128xf32> to vector<1x128xf32>
    %197 = vector.broadcast %196 : vector<1x128xf32> to vector<16x128xf32>
    %198 = arith.mulf %193, %197 : vector<16x128xf32>
    %199 = arith.addf %192, %198 : vector<16x128xf32>
    %c120_i32_76 = arith.constant 120 : i32
    %200 = tpu.dynamic_rotate %186 by %c120_i32_76 dim 1 : vector<16x128xf32>, i32 -> vector<16x128xf32>
    %201 = vector.extract_strided_slice %162 {offsets = [1, 2, 0], sizes = [1, 1, 128], strides = [1, 1, 1]} : vector<3x3x128xf32> to vector<1x1x128xf32>
    %202 = vector.shape_cast %201 : vector<1x1x128xf32> to vector<128xf32>
    %203 = vector.shape_cast %202 : vector<128xf32> to vector<1x128xf32>
    %204 = vector.broadcast %203 : vector<1x128xf32> to vector<16x128xf32>
    %205 = arith.mulf %200, %204 : vector<16x128xf32>
    %206 = arith.addf %199, %205 : vector<16x128xf32>
    %c2_77 = arith.constant 2 : index
    %c0_78 = arith.constant 0 : index
    %207 = vector.load %arg26[%c2_77, %c0_78] : memref<18x128xf32, #tpu.memory_space<vmem>>, vector<16x128xf32>
    %208 = vector.extract_strided_slice %162 {offsets = [2, 1, 0], sizes = [1, 1, 128], strides = [1, 1, 1]} : vector<3x3x128xf32> to vector<1x1x128xf32>
    %209 = vector.shape_cast %208 : vector<1x1x128xf32> to vector<128xf32>
    %210 = vector.shape_cast %209 : vector<128xf32> to vector<1x128xf32>
    %211 = vector.broadcast %210 : vector<1x128xf32> to vector<16x128xf32>
    %212 = arith.mulf %207, %211 : vector<16x128xf32>
    %213 = arith.addf %206, %212 : vector<16x128xf32>
    %c8_i32_79 = arith.constant 8 : i32
    %214 = tpu.dynamic_rotate %207 by %c8_i32_79 dim 1 : vector<16x128xf32>, i32 -> vector<16x128xf32>
    %215 = vector.extract_strided_slice %162 {offsets = [2, 0, 0], sizes = [1, 1, 128], strides = [1, 1, 1]} : vector<3x3x128xf32> to vector<1x1x128xf32>
    %216 = vector.shape_cast %215 : vector<1x1x128xf32> to vector<128xf32>
    %217 = vector.shape_cast %216 : vector<128xf32> to vector<1x128xf32>
    %218 = vector.broadcast %217 : vector<1x128xf32> to vector<16x128xf32>
    %219 = arith.mulf %214, %218 : vector<16x128xf32>
    %220 = arith.addf %213, %219 : vector<16x128xf32>
    %c120_i32_80 = arith.constant 120 : i32
    %221 = tpu.dynamic_rotate %207 by %c120_i32_80 dim 1 : vector<16x128xf32>, i32 -> vector<16x128xf32>
    %222 = vector.extract_strided_slice %162 {offsets = [2, 2, 0], sizes = [1, 1, 128], strides = [1, 1, 1]} : vector<3x3x128xf32> to vector<1x1x128xf32>
    %223 = vector.shape_cast %222 : vector<1x1x128xf32> to vector<128xf32>
    %224 = vector.shape_cast %223 : vector<128xf32> to vector<1x128xf32>
    %225 = vector.broadcast %224 : vector<1x128xf32> to vector<16x128xf32>
    %226 = arith.mulf %221, %225 : vector<16x128xf32>
    %227 = arith.addf %220, %226 : vector<16x128xf32>
    %228 = vector.broadcast %164 : vector<1x128xf32> to vector<16x128xf32>
    %229 = arith.addf %227, %228 : vector<16x128xf32>
    %cst_81 = arith.constant 0.000000e+00 : f32
    %230 = vector.broadcast %cst_81 : f32 to vector<16x128xf32>
    %231 = arith.maximumf %229, %230 : vector<16x128xf32>
    %232 = arith.truncf %231 : vector<16x128xf32> to vector<16x128xbf16>
    %c1_82 = arith.constant 1 : index
    %c0_83 = arith.constant 0 : index
    %c0_84 = arith.constant 0 : index
    %233 = vector.load %arg10[%c1_82, %c0_83, %c0_84] : memref<3x128x128xbf16, #tpu.memory_space<vmem>>, vector<1x128x128xbf16>
    %234 = vector.shape_cast %233 : vector<1x128x128xbf16> to vector<128x128xbf16>
    %cst_85 = arith.constant dense<0.000000e+00> : vector<16x128xf32>
    %235 = tpu.matmul %232, %234, %cst_85 {dimension_numbers = #tpu.dot_dimension_numbers<[1], [0], [0], [1], [0, 0, 1, 1], [], []>} : vector<16x128xbf16>, vector<128x128xbf16>, vector<16x128xf32> -> vector<16x128xf32>
    %236 = arith.addf %159, %235 : vector<16x128xf32>
    %c0_86 = arith.constant 0 : index
    %c0_87 = arith.constant 0 : index
    %c0_88 = arith.constant 0 : index
    %237 = vector.load %arg3[%c0_86, %c0_87, %c0_88] : memref<1x16x128xf32, #tpu.memory_space<vmem>>, vector<1x16x128xf32>
    %238 = vector.shape_cast %237 : vector<1x16x128xf32> to vector<16x128xf32>
    %c2_89 = arith.constant 2 : index
    %c0_90 = arith.constant 0 : index
    %c0_91 = arith.constant 0 : index
    %c0_92 = arith.constant 0 : index
    %239 = vector.load %arg8[%c2_89, %c0_90, %c0_91, %c0_92] : memref<3x3x3x128xf32, #tpu.memory_space<vmem>>, vector<1x3x3x128xf32>
    %240 = vector.shape_cast %239 : vector<1x3x3x128xf32> to vector<3x3x128xf32>
    %c2_93 = arith.constant 2 : index
    %c0_94 = arith.constant 0 : index
    %c0_95 = arith.constant 0 : index
    %241 = vector.load %arg9[%c2_93, %c0_94, %c0_95] : memref<3x1x128xf32, #tpu.memory_space<vmem>>, vector<1x1x128xf32>
    %242 = vector.shape_cast %241 : vector<1x1x128xf32> to vector<1x128xf32>
    %c1_96 = arith.constant 1 : index
    %c0_97 = arith.constant 0 : index
    %243 = vector.load %arg26[%c1_96, %c0_97] : memref<18x128xf32, #tpu.memory_space<vmem>>, vector<16x128xf32>
    tpu.vector_store %arg26[%c1_96, %c0_97], %238 {strides = array<i32>} : memref<18x128xf32, #tpu.memory_space<vmem>>, vector<16x128xf32>,
    %c0_98 = arith.constant 0 : index
    %c0_99 = arith.constant 0 : index
    %244 = vector.load %arg26[%c0_98, %c0_99] : memref<18x128xf32, #tpu.memory_space<vmem>>, vector<16x128xf32>
    %245 = vector.extract_strided_slice %240 {offsets = [0, 1, 0], sizes = [1, 1, 128], strides = [1, 1, 1]} : vector<3x3x128xf32> to vector<1x1x128xf32>
    %246 = vector.shape_cast %245 : vector<1x1x128xf32> to vector<128xf32>
    %247 = vector.shape_cast %246 : vector<128xf32> to vector<1x128xf32>
    %248 = vector.broadcast %247 : vector<1x128xf32> to vector<16x128xf32>
    %249 = arith.mulf %244, %248 : vector<16x128xf32>
    %c8_i32_100 = arith.constant 8 : i32
    %250 = tpu.dynamic_rotate %244 by %c8_i32_100 dim 1 : vector<16x128xf32>, i32 -> vector<16x128xf32>
    %251 = vector.extract_strided_slice %240 {offsets = [0, 0, 0], sizes = [1, 1, 128], strides = [1, 1, 1]} : vector<3x3x128xf32> to vector<1x1x128xf32>
    %252 = vector.shape_cast %251 : vector<1x1x128xf32> to vector<128xf32>
    %253 = vector.shape_cast %252 : vector<128xf32> to vector<1x128xf32>
    %254 = vector.broadcast %253 : vector<1x128xf32> to vector<16x128xf32>
    %255 = arith.mulf %250, %254 : vector<16x128xf32>
    %256 = arith.addf %249, %255 : vector<16x128xf32>
    %c120_i32_101 = arith.constant 120 : i32
    %257 = tpu.dynamic_rotate %244 by %c120_i32_101 dim 1 : vector<16x128xf32>, i32 -> vector<16x128xf32>
    %258 = vector.extract_strided_slice %240 {offsets = [0, 2, 0], sizes = [1, 1, 128], strides = [1, 1, 1]} : vector<3x3x128xf32> to vector<1x1x128xf32>
    %259 = vector.shape_cast %258 : vector<1x1x128xf32> to vector<128xf32>
    %260 = vector.shape_cast %259 : vector<128xf32> to vector<1x128xf32>
    %261 = vector.broadcast %260 : vector<1x128xf32> to vector<16x128xf32>
    %262 = arith.mulf %257, %261 : vector<16x128xf32>
    %263 = arith.addf %256, %262 : vector<16x128xf32>
    %c1_102 = arith.constant 1 : index
    %c0_103 = arith.constant 0 : index
    %264 = vector.load %arg26[%c1_102, %c0_103] : memref<18x128xf32, #tpu.memory_space<vmem>>, vector<16x128xf32>
    %265 = vector.extract_strided_slice %240 {offsets = [1, 1, 0], sizes = [1, 1, 128], strides = [1, 1, 1]} : vector<3x3x128xf32> to vector<1x1x128xf32>
    %266 = vector.shape_cast %265 : vector<1x1x128xf32> to vector<128xf32>
    %267 = vector.shape_cast %266 : vector<128xf32> to vector<1x128xf32>
    %268 = vector.broadcast %267 : vector<1x128xf32> to vector<16x128xf32>
    %269 = arith.mulf %264, %268 : vector<16x128xf32>
    %270 = arith.addf %263, %269 : vector<16x128xf32>
    %c8_i32_104 = arith.constant 8 : i32
    %271 = tpu.dynamic_rotate %264 by %c8_i32_104 dim 1 : vector<16x128xf32>, i32 -> vector<16x128xf32>
    %272 = vector.extract_strided_slice %240 {offsets = [1, 0, 0], sizes = [1, 1, 128], strides = [1, 1, 1]} : vector<3x3x128xf32> to vector<1x1x128xf32>
    %273 = vector.shape_cast %272 : vector<1x1x128xf32> to vector<128xf32>
    %274 = vector.shape_cast %273 : vector<128xf32> to vector<1x128xf32>
    %275 = vector.broadcast %274 : vector<1x128xf32> to vector<16x128xf32>
    %276 = arith.mulf %271, %275 : vector<16x128xf32>
    %277 = arith.addf %270, %276 : vector<16x128xf32>
    %c120_i32_105 = arith.constant 120 : i32
    %278 = tpu.dynamic_rotate %264 by %c120_i32_105 dim 1 : vector<16x128xf32>, i32 -> vector<16x128xf32>
    %279 = vector.extract_strided_slice %240 {offsets = [1, 2, 0], sizes = [1, 1, 128], strides = [1, 1, 1]} : vector<3x3x128xf32> to vector<1x1x128xf32>
    %280 = vector.shape_cast %279 : vector<1x1x128xf32> to vector<128xf32>
    %281 = vector.shape_cast %280 : vector<128xf32> to vector<1x128xf32>
    %282 = vector.broadcast %281 : vector<1x128xf32> to vector<16x128xf32>
    %283 = arith.mulf %278, %282 : vector<16x128xf32>
    %284 = arith.addf %277, %283 : vector<16x128xf32>
    %c2_106 = arith.constant 2 : index
    %c0_107 = arith.constant 0 : index
    %285 = vector.load %arg26[%c2_106, %c0_107] : memref<18x128xf32, #tpu.memory_space<vmem>>, vector<16x128xf32>
    %286 = vector.extract_strided_slice %240 {offsets = [2, 1, 0], sizes = [1, 1, 128], strides = [1, 1, 1]} : vector<3x3x128xf32> to vector<1x1x128xf32>
    %287 = vector.shape_cast %286 : vector<1x1x128xf32> to vector<128xf32>
    %288 = vector.shape_cast %287 : vector<128xf32> to vector<1x128xf32>
    %289 = vector.broadcast %288 : vector<1x128xf32> to vector<16x128xf32>
    %290 = arith.mulf %285, %289 : vector<16x128xf32>
    %291 = arith.addf %284, %290 : vector<16x128xf32>
    %c8_i32_108 = arith.constant 8 : i32
    %292 = tpu.dynamic_rotate %285 by %c8_i32_108 dim 1 : vector<16x128xf32>, i32 -> vector<16x128xf32>
    %293 = vector.extract_strided_slice %240 {offsets = [2, 0, 0], sizes = [1, 1, 128], strides = [1, 1, 1]} : vector<3x3x128xf32> to vector<1x1x128xf32>
    %294 = vector.shape_cast %293 : vector<1x1x128xf32> to vector<128xf32>
    %295 = vector.shape_cast %294 : vector<128xf32> to vector<1x128xf32>
    %296 = vector.broadcast %295 : vector<1x128xf32> to vector<16x128xf32>
    %297 = arith.mulf %292, %296 : vector<16x128xf32>
    %298 = arith.addf %291, %297 : vector<16x128xf32>
    %c120_i32_109 = arith.constant 120 : i32
    %299 = tpu.dynamic_rotate %285 by %c120_i32_109 dim 1 : vector<16x128xf32>, i32 -> vector<16x128xf32>
    %300 = vector.extract_strided_slice %240 {offsets = [2, 2, 0], sizes = [1, 1, 128], strides = [1, 1, 1]} : vector<3x3x128xf32> to vector<1x1x128xf32>
    %301 = vector.shape_cast %300 : vector<1x1x128xf32> to vector<128xf32>
    %302 = vector.shape_cast %301 : vector<128xf32> to vector<1x128xf32>
    %303 = vector.broadcast %302 : vector<1x128xf32> to vector<16x128xf32>
    %304 = arith.mulf %299, %303 : vector<16x128xf32>
    %305 = arith.addf %298, %304 : vector<16x128xf32>
    %306 = vector.broadcast %242 : vector<1x128xf32> to vector<16x128xf32>
    %307 = arith.addf %305, %306 : vector<16x128xf32>
    %cst_110 = arith.constant 0.000000e+00 : f32
    %308 = vector.broadcast %cst_110 : f32 to vector<16x128xf32>
    %309 = arith.maximumf %307, %308 : vector<16x128xf32>
    %310 = arith.truncf %309 : vector<16x128xf32> to vector<16x128xbf16>
    %c2_111 = arith.constant 2 : index
    %c0_112 = arith.constant 0 : index
    %c0_113 = arith.constant 0 : index
    %311 = vector.load %arg10[%c2_111, %c0_112, %c0_113] : memref<3x128x128xbf16, #tpu.memory_space<vmem>>, vector<1x128x128xbf16>
    %312 = vector.shape_cast %311 : vector<1x128x128xbf16> to vector<128x128xbf16>
    %cst_114 = arith.constant dense<0.000000e+00> : vector<16x128xf32>
    %313 = tpu.matmul %310, %312, %cst_114 {dimension_numbers = #tpu.dot_dimension_numbers<[1], [0], [0], [1], [0, 0, 1, 1], [], []>} : vector<16x128xbf16>, vector<128x128xbf16>, vector<16x128xf32> -> vector<16x128xf32>
    %314 = arith.addf %236, %313 : vector<16x128xf32>
    %c0_115 = arith.constant 0 : index
    %c0_116 = arith.constant 0 : index
    %315 = vector.load %arg11[%c0_115, %c0_116] : memref<1x128xf32, #tpu.memory_space<vmem>>, vector<1x128xf32>
    %316 = vector.broadcast %315 : vector<1x128xf32> to vector<16x128xf32>
    %317 = arith.addf %314, %316 : vector<16x128xf32>
    %cst_117 = arith.constant 0.000000e+00 : f32
    %318 = vector.broadcast %cst_117 : f32 to vector<16x128xf32>
    %319 = arith.maximumf %317, %318 : vector<16x128xf32>
    %cst_118 = arith.constant dense<0.000000e+00> : vector<128xf32>
    %320 = vector.multi_reduction <add>, %319, %cst_118 [0] : vector<16x128xf32> to vector<128xf32>
    %321 = vector.shape_cast %320 : vector<128xf32> to vector<1x128xf32>
    %c0_119 = arith.constant 0 : index
    %c0_120 = arith.constant 0 : index
    %322 = vector.load %arg12[%c0_119, %c0_120] : memref<128x8xf32, #tpu.memory_space<vmem>>, vector<128x8xf32>
    %cst_121 = arith.constant dense<0.000000e+00> : vector<1x8xf32>
    %323 = tpu.matmul %321, %322, %cst_121 {dimension_numbers = #tpu.dot_dimension_numbers<[1], [0], [0], [1], [0, 0, 1, 1], [], []>} : vector<1x128xf32>, vector<128x8xf32>, vector<1x8xf32> -> vector<1x8xf32>
    %c0_122 = arith.constant 0 : index
    %c0_123 = arith.constant 0 : index
    %324 = vector.load %arg13[%c0_122, %c0_123] : memref<1x8xf32, #tpu.memory_space<vmem>>, vector<1x8xf32>
    %325 = arith.addf %323, %324 : vector<1x8xf32>
    %cst_124 = arith.constant 0.000000e+00 : f32
    %326 = vector.broadcast %cst_124 : f32 to vector<1x8xf32>
    %327 = arith.maximumf %325, %326 : vector<1x8xf32>
    %c0_125 = arith.constant 0 : index
    %c0_126 = arith.constant 0 : index
    %328 = vector.load %arg14[%c0_125, %c0_126] : memref<8x2xf32, #tpu.memory_space<vmem>>, vector<8x2xf32>
    %cst_127 = arith.constant dense<0.000000e+00> : vector<1x2xf32>
    %329 = tpu.matmul %327, %328, %cst_127 {dimension_numbers = #tpu.dot_dimension_numbers<[1], [0], [0], [1], [0, 0, 1, 1], [], []>} : vector<1x8xf32>, vector<8x2xf32>, vector<1x2xf32> -> vector<1x2xf32>
    %c0_128 = arith.constant 0 : index
    %c0_129 = arith.constant 0 : index
    %330 = vector.load %arg15[%c0_128, %c0_129] : memref<1x2xf32, #tpu.memory_space<vmem>>, vector<1x2xf32>
    %331 = arith.addf %329, %330 : vector<1x2xf32>
    %cst_130 = arith.constant 0.000000e+00 : f32
    %332 = vector.broadcast %cst_130 : f32 to vector<1x2xf32>
    %333 = arith.maximumf %331, %332 : vector<1x2xf32>
    %c0_131 = arith.constant 0 : index
    %c0_132 = arith.constant 0 : index
    %334 = vector.load %arg16[%c0_131, %c0_132] : memref<1x2xf32, #tpu.memory_space<vmem>>, vector<1x2xf32>
    %335 = arith.mulf %333, %334 : vector<1x2xf32>
    %c0_133 = arith.constant 0 : index
    %c0_134 = arith.constant 0 : index
    %336 = vector.load %arg17[%c0_133, %c0_134] : memref<1x2xf32, #tpu.memory_space<vmem>>, vector<1x2xf32>
    %337 = arith.addf %335, %336 : vector<1x2xf32>
    %cst_135 = arith.constant 0.000000e+00 : f32
    %338 = vector.broadcast %cst_135 : f32 to vector<1x2xf32>
    %339 = arith.maximumf %337, %338 : vector<1x2xf32>
    %c0_136 = arith.constant 0 : index
    %c0_137 = arith.constant 0 : index
    %340 = vector.load %arg18[%c0_136, %c0_137] : memref<2x8xf32, #tpu.memory_space<vmem>>, vector<2x8xf32>
    %cst_138 = arith.constant dense<0.000000e+00> : vector<1x8xf32>
    %341 = tpu.matmul %339, %340, %cst_138 {dimension_numbers = #tpu.dot_dimension_numbers<[1], [0], [0], [1], [0, 0, 1, 1], [], []>} : vector<1x2xf32>, vector<2x8xf32>, vector<1x8xf32> -> vector<1x8xf32>
    %c0_139 = arith.constant 0 : index
    %c0_140 = arith.constant 0 : index
    %342 = vector.load %arg19[%c0_139, %c0_140] : memref<1x8xf32, #tpu.memory_space<vmem>>, vector<1x8xf32>
    %343 = arith.addf %341, %342 : vector<1x8xf32>
    %cst_141 = arith.constant 0.000000e+00 : f32
    %344 = vector.broadcast %cst_141 : f32 to vector<1x8xf32>
    %345 = arith.maximumf %343, %344 : vector<1x8xf32>
    %cst_142 = arith.constant 0.000000e+00 : f32
    %346 = vector.broadcast %cst_142 : f32 to vector<1x8xf32>
    %347 = arith.subf %346, %345 : vector<1x8xf32>
    %348 = math.exp %347 : vector<1x8xf32>
    %cst_143 = arith.constant 1.000000e+00 : f32
    %349 = vector.broadcast %cst_143 : f32 to vector<1x8xf32>
    %350 = arith.addf %349, %348 : vector<1x8xf32>
    %cst_144 = arith.constant 1.000000e+00 : f32
    %351 = vector.broadcast %cst_144 : f32 to vector<1x8xf32>
    %352 = arith.divf %351, %350 : vector<1x8xf32>
    %c0_145 = arith.constant 0 : index
    %c0_146 = arith.constant 0 : index
    %353 = vector.load %arg20[%c0_145, %c0_146] : memref<8x128xf32, #tpu.memory_space<vmem>>, vector<8x128xf32>
    %cst_147 = arith.constant dense<0.000000e+00> : vector<1x128xf32>
    %354 = tpu.matmul %352, %353, %cst_147 {dimension_numbers = #tpu.dot_dimension_numbers<[1], [0], [0], [1], [0, 0, 1, 1], [], []>} : vector<1x8xf32>, vector<8x128xf32>, vector<1x128xf32> -> vector<1x128xf32>
    %c0_148 = arith.constant 0 : index
    %c0_149 = arith.constant 0 : index
    %c0_150 = arith.constant 0 : index
    %355 = vector.load %arg1[%c0_148, %c0_149, %c0_150] : memref<1x16x128xf32, #tpu.memory_space<vmem>>, vector<1x16x128xf32>
    %356 = vector.shape_cast %355 : vector<1x16x128xf32> to vector<16x128xf32>
    %c0_151 = arith.constant 0 : index
    %c0_152 = arith.constant 0 : index
    %c0_153 = arith.constant 0 : index
    %357 = vector.load %arg3[%c0_151, %c0_152, %c0_153] : memref<1x16x128xf32, #tpu.memory_space<vmem>>, vector<1x16x128xf32>
    %358 = vector.shape_cast %357 : vector<1x16x128xf32> to vector<16x128xf32>
    %359 = arith.addf %356, %358 : vector<16x128xf32>
    %360 = vector.broadcast %354 : vector<1x128xf32> to vector<16x128xf32>
    %361 = arith.mulf %359, %360 : vector<16x128xf32>
    %c0_154 = arith.constant 0 : index
    %c0_155 = arith.constant 0 : index
    %c0_156 = arith.constant 0 : index
    %c0_157 = arith.constant 0 : index
    %362 = vector.load %arg21[%c0_154, %c0_155, %c0_156, %c0_157] : memref<2x3x3x128xf32, #tpu.memory_space<vmem>>, vector<1x3x3x128xf32>
    %363 = vector.shape_cast %362 : vector<1x3x3x128xf32> to vector<3x3x128xf32>
    %c0_158 = arith.constant 0 : index
    %c0_159 = arith.constant 0 : index
    %c0_160 = arith.constant 0 : index
    %364 = vector.load %arg22[%c0_158, %c0_159, %c0_160] : memref<2x1x128xf32, #tpu.memory_space<vmem>>, vector<1x1x128xf32>
    %365 = vector.shape_cast %364 : vector<1x1x128xf32> to vector<1x128xf32>
    %c1_161 = arith.constant 1 : index
    %c0_162 = arith.constant 0 : index
    %366 = vector.load %arg26[%c1_161, %c0_162] : memref<18x128xf32, #tpu.memory_space<vmem>>, vector<16x128xf32>
    tpu.vector_store %arg26[%c1_161, %c0_162], %361 {strides = array<i32>} : memref<18x128xf32, #tpu.memory_space<vmem>>, vector<16x128xf32>,
    %c0_163 = arith.constant 0 : index
    %c0_164 = arith.constant 0 : index
    %367 = vector.load %arg26[%c0_163, %c0_164] : memref<18x128xf32, #tpu.memory_space<vmem>>, vector<16x128xf32>
    %368 = vector.extract_strided_slice %363 {offsets = [0, 1, 0], sizes = [1, 1, 128], strides = [1, 1, 1]} : vector<3x3x128xf32> to vector<1x1x128xf32>
    %369 = vector.shape_cast %368 : vector<1x1x128xf32> to vector<128xf32>
    %370 = vector.shape_cast %369 : vector<128xf32> to vector<1x128xf32>
    %371 = vector.broadcast %370 : vector<1x128xf32> to vector<16x128xf32>
    %372 = arith.mulf %367, %371 : vector<16x128xf32>
    %c8_i32_165 = arith.constant 8 : i32
    %373 = tpu.dynamic_rotate %367 by %c8_i32_165 dim 1 : vector<16x128xf32>, i32 -> vector<16x128xf32>
    %374 = vector.extract_strided_slice %363 {offsets = [0, 0, 0], sizes = [1, 1, 128], strides = [1, 1, 1]} : vector<3x3x128xf32> to vector<1x1x128xf32>
    %375 = vector.shape_cast %374 : vector<1x1x128xf32> to vector<128xf32>
    %376 = vector.shape_cast %375 : vector<128xf32> to vector<1x128xf32>
    %377 = vector.broadcast %376 : vector<1x128xf32> to vector<16x128xf32>
    %378 = arith.mulf %373, %377 : vector<16x128xf32>
    %379 = arith.addf %372, %378 : vector<16x128xf32>
    %c120_i32_166 = arith.constant 120 : i32
    %380 = tpu.dynamic_rotate %367 by %c120_i32_166 dim 1 : vector<16x128xf32>, i32 -> vector<16x128xf32>
    %381 = vector.extract_strided_slice %363 {offsets = [0, 2, 0], sizes = [1, 1, 128], strides = [1, 1, 1]} : vector<3x3x128xf32> to vector<1x1x128xf32>
    %382 = vector.shape_cast %381 : vector<1x1x128xf32> to vector<128xf32>
    %383 = vector.shape_cast %382 : vector<128xf32> to vector<1x128xf32>
    %384 = vector.broadcast %383 : vector<1x128xf32> to vector<16x128xf32>
    %385 = arith.mulf %380, %384 : vector<16x128xf32>
    %386 = arith.addf %379, %385 : vector<16x128xf32>
    %c1_167 = arith.constant 1 : index
    %c0_168 = arith.constant 0 : index
    %387 = vector.load %arg26[%c1_167, %c0_168] : memref<18x128xf32, #tpu.memory_space<vmem>>, vector<16x128xf32>
    %388 = vector.extract_strided_slice %363 {offsets = [1, 1, 0], sizes = [1, 1, 128], strides = [1, 1, 1]} : vector<3x3x128xf32> to vector<1x1x128xf32>
    %389 = vector.shape_cast %388 : vector<1x1x128xf32> to vector<128xf32>
    %390 = vector.shape_cast %389 : vector<128xf32> to vector<1x128xf32>
    %391 = vector.broadcast %390 : vector<1x128xf32> to vector<16x128xf32>
    %392 = arith.mulf %387, %391 : vector<16x128xf32>
    %393 = arith.addf %386, %392 : vector<16x128xf32>
    %c8_i32_169 = arith.constant 8 : i32
    %394 = tpu.dynamic_rotate %387 by %c8_i32_169 dim 1 : vector<16x128xf32>, i32 -> vector<16x128xf32>
    %395 = vector.extract_strided_slice %363 {offsets = [1, 0, 0], sizes = [1, 1, 128], strides = [1, 1, 1]} : vector<3x3x128xf32> to vector<1x1x128xf32>
    %396 = vector.shape_cast %395 : vector<1x1x128xf32> to vector<128xf32>
    %397 = vector.shape_cast %396 : vector<128xf32> to vector<1x128xf32>
    %398 = vector.broadcast %397 : vector<1x128xf32> to vector<16x128xf32>
    %399 = arith.mulf %394, %398 : vector<16x128xf32>
    %400 = arith.addf %393, %399 : vector<16x128xf32>
    %c120_i32_170 = arith.constant 120 : i32
    %401 = tpu.dynamic_rotate %387 by %c120_i32_170 dim 1 : vector<16x128xf32>, i32 -> vector<16x128xf32>
    %402 = vector.extract_strided_slice %363 {offsets = [1, 2, 0], sizes = [1, 1, 128], strides = [1, 1, 1]} : vector<3x3x128xf32> to vector<1x1x128xf32>
    %403 = vector.shape_cast %402 : vector<1x1x128xf32> to vector<128xf32>
    %404 = vector.shape_cast %403 : vector<128xf32> to vector<1x128xf32>
    %405 = vector.broadcast %404 : vector<1x128xf32> to vector<16x128xf32>
    %406 = arith.mulf %401, %405 : vector<16x128xf32>
    %407 = arith.addf %400, %406 : vector<16x128xf32>
    %c2_171 = arith.constant 2 : index
    %c0_172 = arith.constant 0 : index
    %408 = vector.load %arg26[%c2_171, %c0_172] : memref<18x128xf32, #tpu.memory_space<vmem>>, vector<16x128xf32>
    %409 = vector.extract_strided_slice %363 {offsets = [2, 1, 0], sizes = [1, 1, 128], strides = [1, 1, 1]} : vector<3x3x128xf32> to vector<1x1x128xf32>
    %410 = vector.shape_cast %409 : vector<1x1x128xf32> to vector<128xf32>
    %411 = vector.shape_cast %410 : vector<128xf32> to vector<1x128xf32>
    %412 = vector.broadcast %411 : vector<1x128xf32> to vector<16x128xf32>
    %413 = arith.mulf %408, %412 : vector<16x128xf32>
    %414 = arith.addf %407, %413 : vector<16x128xf32>
    %c8_i32_173 = arith.constant 8 : i32
    %415 = tpu.dynamic_rotate %408 by %c8_i32_173 dim 1 : vector<16x128xf32>, i32 -> vector<16x128xf32>
    %416 = vector.extract_strided_slice %363 {offsets = [2, 0, 0], sizes = [1, 1, 128], strides = [1, 1, 1]} : vector<3x3x128xf32> to vector<1x1x128xf32>
    %417 = vector.shape_cast %416 : vector<1x1x128xf32> to vector<128xf32>
    %418 = vector.shape_cast %417 : vector<128xf32> to vector<1x128xf32>
    %419 = vector.broadcast %418 : vector<1x128xf32> to vector<16x128xf32>
    %420 = arith.mulf %415, %419 : vector<16x128xf32>
    %421 = arith.addf %414, %420 : vector<16x128xf32>
    %c120_i32_174 = arith.constant 120 : i32
    %422 = tpu.dynamic_rotate %408 by %c120_i32_174 dim 1 : vector<16x128xf32>, i32 -> vector<16x128xf32>
    %423 = vector.extract_strided_slice %363 {offsets = [2, 2, 0], sizes = [1, 1, 128], strides = [1, 1, 1]} : vector<3x3x128xf32> to vector<1x1x128xf32>
    %424 = vector.shape_cast %423 : vector<1x1x128xf32> to vector<128xf32>
    %425 = vector.shape_cast %424 : vector<128xf32> to vector<1x128xf32>
    %426 = vector.broadcast %425 : vector<1x128xf32> to vector<16x128xf32>
    %427 = arith.mulf %422, %426 : vector<16x128xf32>
    %428 = arith.addf %421, %427 : vector<16x128xf32>
    %429 = vector.broadcast %365 : vector<1x128xf32> to vector<16x128xf32>
    %430 = arith.addf %428, %429 : vector<16x128xf32>
    %cst_175 = arith.constant 0.000000e+00 : f32
    %431 = vector.broadcast %cst_175 : f32 to vector<16x128xf32>
    %432 = arith.maximumf %430, %431 : vector<16x128xf32>
    %433 = arith.truncf %432 : vector<16x128xf32> to vector<16x128xbf16>
    %c0_176 = arith.constant 0 : index
    %c0_177 = arith.constant 0 : index
    %c0_178 = arith.constant 0 : index
    %434 = vector.load %arg23[%c0_176, %c0_177, %c0_178] : memref<2x128x128xbf16, #tpu.memory_space<vmem>>, vector<1x128x128xbf16>
    %435 = vector.shape_cast %434 : vector<1x128x128xbf16> to vector<128x128xbf16>
    %cst_179 = arith.constant dense<0.000000e+00> : vector<16x128xf32>
    %436 = tpu.matmul %433, %435, %cst_179 {dimension_numbers = #tpu.dot_dimension_numbers<[1], [0], [0], [1], [0, 0, 1, 1], [], []>} : vector<16x128xbf16>, vector<128x128xbf16>, vector<16x128xf32> -> vector<16x128xf32>
    %c0_180 = arith.constant 0 : index
    %c0_181 = arith.constant 0 : index
    %437 = vector.load %arg27[%c0_180, %c0_181] : memref<16x128xf32, #tpu.memory_space<vmem>>, vector<16x128xf32>
    %c1_182 = arith.constant 1 : index
    %c0_183 = arith.constant 0 : index
    %c0_184 = arith.constant 0 : index
    %c0_185 = arith.constant 0 : index
    %438 = vector.load %arg21[%c1_182, %c0_183, %c0_184, %c0_185] : memref<2x3x3x128xf32, #tpu.memory_space<vmem>>, vector<1x3x3x128xf32>
    %439 = vector.shape_cast %438 : vector<1x3x3x128xf32> to vector<3x3x128xf32>
    %c1_186 = arith.constant 1 : index
    %c0_187 = arith.constant 0 : index
    %c0_188 = arith.constant 0 : index
    %440 = vector.load %arg22[%c1_186, %c0_187, %c0_188] : memref<2x1x128xf32, #tpu.memory_space<vmem>>, vector<1x1x128xf32>
    %441 = vector.shape_cast %440 : vector<1x1x128xf32> to vector<1x128xf32>
    %c1_189 = arith.constant 1 : index
    %c0_190 = arith.constant 0 : index
    %442 = vector.load %arg26[%c1_189, %c0_190] : memref<18x128xf32, #tpu.memory_space<vmem>>, vector<16x128xf32>
    tpu.vector_store %arg26[%c1_189, %c0_190], %437 {strides = array<i32>} : memref<18x128xf32, #tpu.memory_space<vmem>>, vector<16x128xf32>,
    %c0_191 = arith.constant 0 : index
    %c0_192 = arith.constant 0 : index
    %443 = vector.load %arg26[%c0_191, %c0_192] : memref<18x128xf32, #tpu.memory_space<vmem>>, vector<16x128xf32>
    %444 = vector.extract_strided_slice %439 {offsets = [0, 1, 0], sizes = [1, 1, 128], strides = [1, 1, 1]} : vector<3x3x128xf32> to vector<1x1x128xf32>
    %445 = vector.shape_cast %444 : vector<1x1x128xf32> to vector<128xf32>
    %446 = vector.shape_cast %445 : vector<128xf32> to vector<1x128xf32>
    %447 = vector.broadcast %446 : vector<1x128xf32> to vector<16x128xf32>
    %448 = arith.mulf %443, %447 : vector<16x128xf32>
    %c8_i32_193 = arith.constant 8 : i32
    %449 = tpu.dynamic_rotate %443 by %c8_i32_193 dim 1 : vector<16x128xf32>, i32 -> vector<16x128xf32>
    %450 = vector.extract_strided_slice %439 {offsets = [0, 0, 0], sizes = [1, 1, 128], strides = [1, 1, 1]} : vector<3x3x128xf32> to vector<1x1x128xf32>
    %451 = vector.shape_cast %450 : vector<1x1x128xf32> to vector<128xf32>
    %452 = vector.shape_cast %451 : vector<128xf32> to vector<1x128xf32>
    %453 = vector.broadcast %452 : vector<1x128xf32> to vector<16x128xf32>
    %454 = arith.mulf %449, %453 : vector<16x128xf32>
    %455 = arith.addf %448, %454 : vector<16x128xf32>
    %c120_i32_194 = arith.constant 120 : i32
    %456 = tpu.dynamic_rotate %443 by %c120_i32_194 dim 1 : vector<16x128xf32>, i32 -> vector<16x128xf32>
    %457 = vector.extract_strided_slice %439 {offsets = [0, 2, 0], sizes = [1, 1, 128], strides = [1, 1, 1]} : vector<3x3x128xf32> to vector<1x1x128xf32>
    %458 = vector.shape_cast %457 : vector<1x1x128xf32> to vector<128xf32>
    %459 = vector.shape_cast %458 : vector<128xf32> to vector<1x128xf32>
    %460 = vector.broadcast %459 : vector<1x128xf32> to vector<16x128xf32>
    %461 = arith.mulf %456, %460 : vector<16x128xf32>
    %462 = arith.addf %455, %461 : vector<16x128xf32>
    %c1_195 = arith.constant 1 : index
    %c0_196 = arith.constant 0 : index
    %463 = vector.load %arg26[%c1_195, %c0_196] : memref<18x128xf32, #tpu.memory_space<vmem>>, vector<16x128xf32>
    %464 = vector.extract_strided_slice %439 {offsets = [1, 1, 0], sizes = [1, 1, 128], strides = [1, 1, 1]} : vector<3x3x128xf32> to vector<1x1x128xf32>
    %465 = vector.shape_cast %464 : vector<1x1x128xf32> to vector<128xf32>
    %466 = vector.shape_cast %465 : vector<128xf32> to vector<1x128xf32>
    %467 = vector.broadcast %466 : vector<1x128xf32> to vector<16x128xf32>
    %468 = arith.mulf %463, %467 : vector<16x128xf32>
    %469 = arith.addf %462, %468 : vector<16x128xf32>
    %c8_i32_197 = arith.constant 8 : i32
    %470 = tpu.dynamic_rotate %463 by %c8_i32_197 dim 1 : vector<16x128xf32>, i32 -> vector<16x128xf32>
    %471 = vector.extract_strided_slice %439 {offsets = [1, 0, 0], sizes = [1, 1, 128], strides = [1, 1, 1]} : vector<3x3x128xf32> to vector<1x1x128xf32>
    %472 = vector.shape_cast %471 : vector<1x1x128xf32> to vector<128xf32>
    %473 = vector.shape_cast %472 : vector<128xf32> to vector<1x128xf32>
    %474 = vector.broadcast %473 : vector<1x128xf32> to vector<16x128xf32>
    %475 = arith.mulf %470, %474 : vector<16x128xf32>
    %476 = arith.addf %469, %475 : vector<16x128xf32>
    %c120_i32_198 = arith.constant 120 : i32
    %477 = tpu.dynamic_rotate %463 by %c120_i32_198 dim 1 : vector<16x128xf32>, i32 -> vector<16x128xf32>
    %478 = vector.extract_strided_slice %439 {offsets = [1, 2, 0], sizes = [1, 1, 128], strides = [1, 1, 1]} : vector<3x3x128xf32> to vector<1x1x128xf32>
    %479 = vector.shape_cast %478 : vector<1x1x128xf32> to vector<128xf32>
    %480 = vector.shape_cast %479 : vector<128xf32> to vector<1x128xf32>
    %481 = vector.broadcast %480 : vector<1x128xf32> to vector<16x128xf32>
    %482 = arith.mulf %477, %481 : vector<16x128xf32>
    %483 = arith.addf %476, %482 : vector<16x128xf32>
    %c2_199 = arith.constant 2 : index
    %c0_200 = arith.constant 0 : index
    %484 = vector.load %arg26[%c2_199, %c0_200] : memref<18x128xf32, #tpu.memory_space<vmem>>, vector<16x128xf32>
    %485 = vector.extract_strided_slice %439 {offsets = [2, 1, 0], sizes = [1, 1, 128], strides = [1, 1, 1]} : vector<3x3x128xf32> to vector<1x1x128xf32>
    %486 = vector.shape_cast %485 : vector<1x1x128xf32> to vector<128xf32>
    %487 = vector.shape_cast %486 : vector<128xf32> to vector<1x128xf32>
    %488 = vector.broadcast %487 : vector<1x128xf32> to vector<16x128xf32>
    %489 = arith.mulf %484, %488 : vector<16x128xf32>
    %490 = arith.addf %483, %489 : vector<16x128xf32>
    %c8_i32_201 = arith.constant 8 : i32
    %491 = tpu.dynamic_rotate %484 by %c8_i32_201 dim 1 : vector<16x128xf32>, i32 -> vector<16x128xf32>
    %492 = vector.extract_strided_slice %439 {offsets = [2, 0, 0], sizes = [1, 1, 128], strides = [1, 1, 1]} : vector<3x3x128xf32> to vector<1x1x128xf32>
    %493 = vector.shape_cast %492 : vector<1x1x128xf32> to vector<128xf32>
    %494 = vector.shape_cast %493 : vector<128xf32> to vector<1x128xf32>
    %495 = vector.broadcast %494 : vector<1x128xf32> to vector<16x128xf32>
    %496 = arith.mulf %491, %495 : vector<16x128xf32>
    %497 = arith.addf %490, %496 : vector<16x128xf32>
    %c120_i32_202 = arith.constant 120 : i32
    %498 = tpu.dynamic_rotate %484 by %c120_i32_202 dim 1 : vector<16x128xf32>, i32 -> vector<16x128xf32>
    %499 = vector.extract_strided_slice %439 {offsets = [2, 2, 0], sizes = [1, 1, 128], strides = [1, 1, 1]} : vector<3x3x128xf32> to vector<1x1x128xf32>
    %500 = vector.shape_cast %499 : vector<1x1x128xf32> to vector<128xf32>
    %501 = vector.shape_cast %500 : vector<128xf32> to vector<1x128xf32>
    %502 = vector.broadcast %501 : vector<1x128xf32> to vector<16x128xf32>
    %503 = arith.mulf %498, %502 : vector<16x128xf32>
    %504 = arith.addf %497, %503 : vector<16x128xf32>
    %505 = vector.broadcast %441 : vector<1x128xf32> to vector<16x128xf32>
    %506 = arith.addf %504, %505 : vector<16x128xf32>
    %cst_203 = arith.constant 0.000000e+00 : f32
    %507 = vector.broadcast %cst_203 : f32 to vector<16x128xf32>
    %508 = arith.maximumf %506, %507 : vector<16x128xf32>
    %509 = arith.truncf %508 : vector<16x128xf32> to vector<16x128xbf16>
    %c1_204 = arith.constant 1 : index
    %c0_205 = arith.constant 0 : index
    %c0_206 = arith.constant 0 : index
    %510 = vector.load %arg23[%c1_204, %c0_205, %c0_206] : memref<2x128x128xbf16, #tpu.memory_space<vmem>>, vector<1x128x128xbf16>
    %511 = vector.shape_cast %510 : vector<1x128x128xbf16> to vector<128x128xbf16>
    %cst_207 = arith.constant dense<0.000000e+00> : vector<16x128xf32>
    %512 = tpu.matmul %509, %511, %cst_207 {dimension_numbers = #tpu.dot_dimension_numbers<[1], [0], [0], [1], [0, 0, 1, 1], [], []>} : vector<16x128xbf16>, vector<128x128xbf16>, vector<16x128xf32> -> vector<16x128xf32>
    %513 = arith.addf %436, %512 : vector<16x128xf32>
    %c0_208 = arith.constant 0 : index
    %c0_209 = arith.constant 0 : index
    %514 = vector.load %arg24[%c0_208, %c0_209] : memref<1x128xf32, #tpu.memory_space<vmem>>, vector<1x128xf32>
    %515 = vector.broadcast %514 : vector<1x128xf32> to vector<16x128xf32>
    %516 = arith.addf %513, %515 : vector<16x128xf32>
    %cst_210 = arith.constant 0.000000e+00 : f32
    %517 = vector.broadcast %cst_210 : f32 to vector<16x128xf32>
    %518 = arith.maximumf %516, %517 : vector<16x128xf32>
    %c0_211 = arith.constant 0 : index
    %c0_212 = arith.constant 0 : index
    %c0_213 = arith.constant 0 : index
    %519 = vector.load %arg25[%c0_211, %c0_212, %c0_213] : memref<1x16x128xf32, #tpu.memory_space<vmem>>, vector<1x16x128xf32>
    %520 = vector.shape_cast %519 : vector<1x16x128xf32> to vector<16x128xf32>
    %521 = vector.shape_cast %518 : vector<16x128xf32> to vector<1x16x128xf32>
    tpu.vector_store %arg25[%c0_211, %c0_212, %c0_213], %521 {strides = array<i32>} : memref<1x16x128xf32, #tpu.memory_space<vmem>>, vector<1x16x128xf32>,
    return
  }
  func.func @transform_0(%arg0: i32) -> (i32, i32, i32) {
    %c0_i32 = arith.constant 0 : i32
    %c0_i32_0 = arith.constant 0 : i32
    %c0_i32_1 = arith.constant 0 : i32
    return %arg0, %c0_i32, %c0_i32_0 : i32, i32, i32
  }
  func.func @transform_1(%arg0: i32) -> (i32, i32, i32) {
    %c0_i32 = arith.constant 0 : i32
    %c0_i32_0 = arith.constant 0 : i32
    %c0_i32_1 = arith.constant 0 : i32
    return %arg0, %c0_i32, %c0_i32_0 : i32, i32, i32
  }
  func.func @transform_2(%arg0: i32) -> (i32, i32, i32) {
    %c0_i32 = arith.constant 0 : i32
    %c0_i32_0 = arith.constant 0 : i32
    %c0_i32_1 = arith.constant 0 : i32
    return %arg0, %c0_i32, %c0_i32_0 : i32, i32, i32
  }
  func.func @transform_3(%arg0: i32) -> (i32, i32, i32) {
    %c0_i32 = arith.constant 0 : i32
    %c0_i32_0 = arith.constant 0 : i32
    %c0_i32_1 = arith.constant 0 : i32
    %c0_i32_2 = arith.constant 0 : i32
    return %c0_i32, %c0_i32_0, %c0_i32_1 : i32, i32, i32
  }
  func.func @transform_4(%arg0: i32) -> (i32, i32) {
    %c0_i32 = arith.constant 0 : i32
    %c0_i32_0 = arith.constant 0 : i32
    %c0_i32_1 = arith.constant 0 : i32
    return %c0_i32, %c0_i32_0 : i32, i32
  }
  func.func @transform_5(%arg0: i32) -> (i32, i32) {
    %c0_i32 = arith.constant 0 : i32
    %c0_i32_0 = arith.constant 0 : i32
    %c0_i32_1 = arith.constant 0 : i32
    return %c0_i32, %c0_i32_0 : i32, i32
  }
  func.func @transform_6(%arg0: i32) -> (i32, i32) {
    %c0_i32 = arith.constant 0 : i32
    %c0_i32_0 = arith.constant 0 : i32
    %c0_i32_1 = arith.constant 0 : i32
    return %c0_i32, %c0_i32_0 : i32, i32
  }
  func.func @transform_7(%arg0: i32) -> (i32, i32, i32, i32) {
    %c0_i32 = arith.constant 0 : i32
    %c0_i32_0 = arith.constant 0 : i32
    %c0_i32_1 = arith.constant 0 : i32
    %c0_i32_2 = arith.constant 0 : i32
    %c0_i32_3 = arith.constant 0 : i32
    return %c0_i32, %c0_i32_0, %c0_i32_1, %c0_i32_2 : i32, i32, i32, i32
  }
  func.func @transform_8(%arg0: i32) -> (i32, i32, i32) {
    %c0_i32 = arith.constant 0 : i32
    %c0_i32_0 = arith.constant 0 : i32
    %c0_i32_1 = arith.constant 0 : i32
    %c0_i32_2 = arith.constant 0 : i32
    return %c0_i32, %c0_i32_0, %c0_i32_1 : i32, i32, i32
  }
  func.func @transform_9(%arg0: i32) -> (i32, i32, i32) {
    %c0_i32 = arith.constant 0 : i32
    %c0_i32_0 = arith.constant 0 : i32
    %c0_i32_1 = arith.constant 0 : i32
    %c0_i32_2 = arith.constant 0 : i32
    return %c0_i32, %c0_i32_0, %c0_i32_1 : i32, i32, i32
  }
  func.func @transform_10(%arg0: i32) -> (i32, i32) {
    %c0_i32 = arith.constant 0 : i32
    %c0_i32_0 = arith.constant 0 : i32
    %c0_i32_1 = arith.constant 0 : i32
    return %c0_i32, %c0_i32_0 : i32, i32
  }
  func.func @transform_11(%arg0: i32) -> (i32, i32) {
    %c0_i32 = arith.constant 0 : i32
    %c0_i32_0 = arith.constant 0 : i32
    %c0_i32_1 = arith.constant 0 : i32
    return %c0_i32, %c0_i32_0 : i32, i32
  }
  func.func @transform_12(%arg0: i32) -> (i32, i32) {
    %c0_i32 = arith.constant 0 : i32
    %c0_i32_0 = arith.constant 0 : i32
    %c0_i32_1 = arith.constant 0 : i32
    return %c0_i32, %c0_i32_0 : i32, i32
  }
  func.func @transform_13(%arg0: i32) -> (i32, i32) {
    %c0_i32 = arith.constant 0 : i32
    %c0_i32_0 = arith.constant 0 : i32
    %c0_i32_1 = arith.constant 0 : i32
    return %c0_i32, %c0_i32_0 : i32, i32
  }
  func.func @transform_14(%arg0: i32) -> (i32, i32) {
    %c0_i32 = arith.constant 0 : i32
    %c0_i32_0 = arith.constant 0 : i32
    %c0_i32_1 = arith.constant 0 : i32
    return %c0_i32, %c0_i32_0 : i32, i32
  }
  func.func @transform_15(%arg0: i32) -> (i32, i32) {
    %c0_i32 = arith.constant 0 : i32
    %c0_i32_0 = arith.constant 0 : i32
    %c0_i32_1 = arith.constant 0 : i32
    return %c0_i32, %c0_i32_0 : i32, i32
  }
  func.func @transform_16(%arg0: i32) -> (i32, i32) {
    %c0_i32 = arith.constant 0 : i32
    %c0_i32_0 = arith.constant 0 : i32
    %c0_i32_1 = arith.constant 0 : i32
    return %c0_i32, %c0_i32_0 : i32, i32
  }
  func.func @transform_17(%arg0: i32) -> (i32, i32) {
    %c0_i32 = arith.constant 0 : i32
    %c0_i32_0 = arith.constant 0 : i32
    %c0_i32_1 = arith.constant 0 : i32
    return %c0_i32, %c0_i32_0 : i32, i32
  }
  func.func @transform_18(%arg0: i32) -> (i32, i32) {
    %c0_i32 = arith.constant 0 : i32
    %c0_i32_0 = arith.constant 0 : i32
    %c0_i32_1 = arith.constant 0 : i32
    return %c0_i32, %c0_i32_0 : i32, i32
  }
  func.func @transform_19(%arg0: i32) -> (i32, i32) {
    %c0_i32 = arith.constant 0 : i32
    %c0_i32_0 = arith.constant 0 : i32
    %c0_i32_1 = arith.constant 0 : i32
    return %c0_i32, %c0_i32_0 : i32, i32
  }
  func.func @transform_20(%arg0: i32) -> (i32, i32, i32, i32) {
    %c0_i32 = arith.constant 0 : i32
    %c0_i32_0 = arith.constant 0 : i32
    %c0_i32_1 = arith.constant 0 : i32
    %c0_i32_2 = arith.constant 0 : i32
    %c0_i32_3 = arith.constant 0 : i32
    return %c0_i32, %c0_i32_0, %c0_i32_1, %c0_i32_2 : i32, i32, i32, i32
  }
  func.func @transform_21(%arg0: i32) -> (i32, i32, i32) {
    %c0_i32 = arith.constant 0 : i32
    %c0_i32_0 = arith.constant 0 : i32
    %c0_i32_1 = arith.constant 0 : i32
    %c0_i32_2 = arith.constant 0 : i32
    return %c0_i32, %c0_i32_0, %c0_i32_1 : i32, i32, i32
  }
  func.func @transform_22(%arg0: i32) -> (i32, i32, i32) {
    %c0_i32 = arith.constant 0 : i32
    %c0_i32_0 = arith.constant 0 : i32
    %c0_i32_1 = arith.constant 0 : i32
    %c0_i32_2 = arith.constant 0 : i32
    return %c0_i32, %c0_i32_0, %c0_i32_1 : i32, i32, i32
  }
  func.func @transform_23(%arg0: i32) -> (i32, i32) {
    %c0_i32 = arith.constant 0 : i32
    %c0_i32_0 = arith.constant 0 : i32
    %c0_i32_1 = arith.constant 0 : i32
    return %c0_i32, %c0_i32_0 : i32, i32
  }
  func.func @transform_24(%arg0: i32) -> (i32, i32, i32) {
    %c0_i32 = arith.constant 0 : i32
    %c0_i32_0 = arith.constant 0 : i32
    %c0_i32_1 = arith.constant 0 : i32
    return %arg0, %c0_i32, %c0_i32_0 : i32, i32, i32
  }
}

</mosaic_0001>

<bundles_post_ra>
// kernel: aca_v3_forward.1
= control target key start
LH: loop header
LB: loop body
LE: loop exit
PB: predicated region body
PF: predicated region fallthrough
CT: control target
= control target key end

     0   :  { %s3945_s0 = inlined_call_operand.vmem [shape: f32[2,16,128], index: 0, kind: input, shape index: {}]   ;;  %s3946_s1 = inlined_call_operand.vmem [shape: f32[2,16,128], index: 1, kind: input, shape index: {}]   ;;  %s3947_s2 = inlined_call_operand.vmem [shape: f32[2,16,128], index: 2, kind: input, shape index: {}]   ;;  %s3948_s3 = inlined_call_operand.vmem [shape: f32[3,3,128], index: 3, kind: input, shape index: {}]   ;;  %s3949_s4 = inlined_call_operand.vmem [shape: f32[1,128], index: 4, kind: input, shape index: {}]   ;;  %s3950_s5 = inlined_call_operand.vmem [shape: bf16[128,128], index: 5, kind: input, shape index: {}]   ;;  %s3951_s6 = inlined_call_operand.vmem [shape: f32[1,128], index: 6, kind: input, shape index: {}]   ;;  %s3952_s7 = inlined_call_operand.vmem [shape: f32[3,3,3,128], index: 7, kind: input, shape index: {}]   ;;  %s3953_s8 = inlined_call_operand.vmem [shape: f32[3,1,128], index: 8, kind: input, shape index: {}]   ;;  %s3954_s9 = inlined_call_operand.vmem [shape: bf16[3,128,128], index: 9, kind: input, shape index: {}]   ;;  %s3955_s10 = inlined_call_operand.vmem [shape: f32[1,128], index: 10, kind: input, shape index: {}]   ;;  %s3956_s11 = inlined_call_operand.vmem [shape: f32[128,8], index: 11, kind: input, shape index: {}]   ;;  %s3957_s12 = inlined_call_operand.vmem [shape: f32[1,8], index: 12, kind: input, shape index: {}]   ;;  %s3958_s13 = inlined_call_operand.vmem [shape: f32[8,2], index: 13, kind: input, shape index: {}]   ;;  %s3959_s14 = inlined_call_operand.vmem [shape: f32[1,2], index: 14, kind: input, shape index: {}]   ;;  %s3960_s15 = inlined_call_operand.vmem [shape: f32[1,2], index: 15, kind: input, shape index: {}]   ;;  %s3961_s16 = inlined_call_operand.vmem [shape: f32[1,2], index: 16, kind: input, shape index: {}]   ;;  %s3962_s17 = inlined_call_operand.vmem [shape: f32[2,8], index: 17, kind: input, shape index: {}]   ;;  %s3963_s18 = inlined_call_operand.vmem [shape: f32[1,8], index: 18, kind: input, shape index: {}]   ;;  %s3964_s19 = inlined_call_operand.vmem [shape: f32[8,128], index: 19, kind: input, shape index: {}]   ;;  %s3965_s20 = inlined_call_operand.vmem [shape: f32[2,3,3,128], index: 20, kind: input, shape index: {}]   ;;  %s3966_s21 = inlined_call_operand.vmem [shape: f32[2,1,128], index: 21, kind: input, shape index: {}]   ;;  %s3967_s22 = inlined_call_operand.vmem [shape: bf16[2,128,128], index: 22, kind: input, shape index: {}]   ;;  %s3968_s23 = inlined_call_operand.vmem [shape: f32[1,128], index: 23, kind: input, shape index: {}]   ;;  %s3969_s24 = inlined_call_operand.vmem [shape: f32[2,16,128], index: 24, kind: output, shape index: {}]  }
   0x1   :  { %3980 = sst [smem:[#allocation4_spill]] %s3945_s0 }
   0x2   :  { %3981 = sst [smem:[#allocation5_spill]] %s3946_s1 }
   0x3   :  { %3982 = sst [smem:[#allocation6_spill]] %s3947_s2 }
   0x4   :  { %3983 = sst [smem:[#allocation7_spill]] %s3948_s3 }
   0x5   :  { %3984 = sst [smem:[#allocation8_spill]] %s3949_s4 }
   0x6   :  { %3985 = sst [smem:[#allocation9_spill]] %s3950_s5  ;;  %s3212_s5 = smov 0  }
   0x7   :  { %3986 = sst [smem:[#allocation10_spill]] %s3951_s6 }
   0x8   :  { %3987 = sst [smem:[#allocation11_spill]] %s3952_s7 }
   0x9   :  { %3988 = sst [smem:[#allocation12_spill]] %s3953_s8 }
   0xa LB: > { %s2598_s26 = sadd.s32 4294967295, %s3080_s5   ;;  %p2602_p0 = scmp.ge.s32.totalorder %s3080_s5, 1  ;;  %s3080_s5 = sphi %s3212_s5, %s34_s5  }
   0xb   : > { %p682_p1 = scmp.lt.s32.totalorder %s3080_s5, 3 }
   0xd   : > { %p683_p2 = pnand %p2602_p0, %p682_p1 }
   0xe   : > { %p758_p3 = scmp.lt.s32.totalorder (!%p683_p2), %s2598_s26, 1  ;;  %s3989_s6 = sld [smem:[#allocation9_spill]] (!%p683_p2)  ;;  %v3082_v1 = vmov (!%p683_p2), 0.0   ;;  %vm3085_vm0 = vmmov (!%p683_p2), 0   ;;  %v791_v19 = vlaneseq (!%p683_p2)  ;;  %vm1804_vm1 = vcmask (!%p683_p2), 64512  }
   0xf   : > { %686 = sbr.rel (%p683_p2) target bundleno = 2112 (0x840), region = 116  ;;  %779 = vst [vmem:[#allocation2] sm:$0x1] (!%p683_p2), %v3082_v1  ;;  %780 = vst [vmem:[#allocation2 + $0x11] sm:$0x1] (!%p683_p2), %v3082_v1  ;;  %2815 = vmatprep.subr.bf16.mxu0 (!%p683_p2), %v3082_v1  ;;  %2835 = vmatprep.subr.bf16.mxu1 (!%p683_p2), %v3082_v1  ;;  %s3990_s3 = sld [smem:[#allocation5_spill]] (!%p683_p2) }
  0x10   : > { %s3991_s1 = sld [smem:[#allocation4_spill]] (!%p683_p2)  ;;  %s3974_s7 = smov (!%p683_p2), 120   ;;  %2831 = vmatprep.mubr.msk.bf16.mxu0 (!%p683_p2), %vm3085_vm0, %v3082_v1  ;;  %2851 = vmatprep.mubr.msk.bf16.mxu1 (!%p683_p2), %vm3085_vm0, %v3082_v1  ;;  %v792_v20 = vshrl.u32 (!%p683_p2), %v791_v19, 7  ;;  %vm1890_vm2 = vcmask (!%p683_p2), 1041408   ;;  %vm1886_vm3 = vcmask (!%p683_p2), 15360  }
  0x11   : > { %s3976_s30 = smov (!%p683_p2), 8   ;;  %s3993_s29 = sld [smem:[#allocation8_spill]] (!%p683_p2) }
  0x12   : > { %v3330_v21 = vsub.s32 (!%p683_p2), 1, %v792_v20  ;;  %v3335_v23 = vsub.s32 (!%p683_p2), 0, %v792_v20  ;;  %v3338_v25 = vsub.s32 (!%p683_p2), 2, %v792_v20  ;;  %s3994_s4 = sld [smem:[#allocation10_spill]] (!%p683_p2)  ;;  %s3995_s28 = sld [smem:[#allocation6_spill]] (!%p683_p2) }
  0x14   : > { %v3022_v0 = vld [vmem:[%s3989_s6] sm:$0xff] (!%p683_p2)   ;;  %v3023_v2 = vld [vmem:[%s3989_s6 + $0x8] sm:$0xff] (!%p683_p2)   ;;  %v3024_v5 = vld [vmem:[%s3989_s6 + $0x10] sm:$0xff] (!%p683_p2)  }
  0x15   : > { %2816 = vmatpush3.bf16.msra.mxu0 (!%p683_p2), %v3022_v0  ;;  %v3025_v7 = vld [vmem:[%s3989_s6 + $0x18] sm:$0xff] (!%p683_p2)   ;;  %v3026_v13 = vld [vmem:[%s3989_s6 + $0x20] sm:$0xff] (!%p683_p2)   ;;  %v3027_v14 = vld [vmem:[%s3989_s6 + $0x28] sm:$0xff] (!%p683_p2)  }
  0x16   : > { %s4001_s26 = smov (!%p758_p3, %s2598_s26), 1  ;;  %2817 = vmatprep.subr.bf16.mxu0 %v3082_v1  ;;  %v3028_v15 = vld [vmem:[%s3989_s6 + $0x30] sm:$0xff]   ;;  %v3029_v16 = vld [vmem:[%s3989_s6 + $0x38] sm:$0xff]  }
  0x17   : > { %s3231_s0 = sshll.u32 %s4001_s26, 4 }
  0x18   : > { %s767_s25 = scalar_lea.vmem %s3990_s3, %s3231_s0  ;;  %s3247_s26 = scalar_lea.vmem %s3991_s1, %s3231_s0 }
  0x19   : > { %v3237_v3 = vld [vmem:[%s767_s25] sm:$0xff]  ;;  %v3239_v4 = vld [vmem:[%s767_s25 + $0x8] sm:$0xff]  ;;  %2818 = vmatpush3.bf16.msra.mxu0 %v3023_v2  ;;  %s3992_s25 = sld [smem:[#allocation7_spill]]  ;;  %s3394_s2 = scalar_lea.vmem %s3995_s28, %s3231_s0 }
  0x1a   : > { %787 = vst [vmem:[#allocation2 + $0x1] sm:$0xff] %v3237_v3  ;;  %788 = vst [vmem:[#allocation2 + $0x9] sm:$0xff] %v3239_v4  ;;  %2819 = vmatprep.subr.bf16.mxu0 %v3082_v1  ;;  %v3254_v6 = vld [vmem:[%s3247_s26] sm:$0xff]  ;;  %v3261_v8 = vld [vmem:[%s3247_s26 + $0x8] sm:$0xff]  ;;  %s3996_s28 = smov 120   ;;  %s3998_s1 = sld [smem:[#allocation12_spill]] }
  0x1b   : > { %s3999_s3 = smov 8  }
  0x1d   : > { %2820 = vmatpush3.bf16.msra.mxu0 %v3024_v5 }
  0x1e   : > { %2821 = vmatprep.subr.bf16.mxu0 %v3082_v1 }
  0x1f   : > { %v783_v22 = vld [vmem:[%s3992_s25] sm:$0x7]  ;;  %v784_v28 = vld [vmem:[%s3992_s25 + $0x4] sm:$0x7]  ;;  %v785_v41 = vld [vmem:[%s3992_s25 + $0x8] sm:$0x7] }
  0x20   : > { %v794_v24 = vrot.slane %v783_v22, %v3330_v21  ;;  %v804_v26 = vrot.slane %v783_v22, %v3335_v23  ;;  %v816_v31 = vrot.slane %v783_v22, %v3338_v25  ;;  %v826_v33 = vrot.slane %v784_v28, %v3330_v21  ;;  %v2611_v22 = vld [vmem:[%s3993_s29] ss:$0 sm:$0xff]  ;;  %s777_s29 = scalar_lea.vmem %s3969_s24, %s3231_s0 }
  0x21   : > { %v789_v9 = vld [vmem:[#allocation2] sm:$0xff]  ;;  %v790_v10 = vld [vmem:[#allocation2 + $0x8] sm:$0xff]  ;;  %2822 = vmatpush3.bf16.msra.mxu0 %v3025_v7  ;;  %v838_v40 = vrot.slane %v784_v28, %v3335_v23  ;;  %v860_v49 = vrot.slane %v785_v41, %v3330_v21  ;;  %v850_v52 = vrot.slane %v784_v28, %v3338_v25  ;;  %v872_v59 = vrot.slane %v785_v41, %v3335_v23 }
  0x22   : > { %v3263_v11 = vld [vmem:[#allocation2 + $0x2] sm:$0xff]  ;;  %809 = vrot.lane.b32.xlu1 %v789_v9, %s3974_s7  ;;  %797 = vrot.lane.b32.xlu0 %v789_v9, %s3976_s30  ;;  %v3267_v12 = vld [vmem:[#allocation2 + $0xa] sm:$0xff]  ;;  %v795_v27 = vmul.f32 %v794_v24, %v789_v9  ;;  %v796_v35 = vmul.f32 %v794_v24, %v790_v10  ;;  %v827_v42 = vmul.f32 %v826_v33, %v3237_v3 }
  0x23   : > { %1022 = vst [vmem:[#allocation2 + $0x1] sm:$0xff] %v3254_v6  ;;  %1023 = vst [vmem:[#allocation2 + $0x9] sm:$0xff] %v3261_v8  ;;  %2823 = vmatprep.subr.bf16.mxu0 %v3082_v1  ;;  %v828_v46 = vmul.f32 %v826_v33, %v3239_v4  ;;  %v862_v58 = vmul.f32 %v860_v49, %v3267_v12  ;;  %v861_v60 = vmul.f32 %v860_v49, %v3263_v11  ;;  %v3030_v33 = vld [vmem:[%s3954_s9 + $0x40] sm:$0xff]  }
  0x24   : > { %v884_v7 = vrot.slane %v785_v41, %v3338_v25  ;;  %2836 = vmatpush3.bf16.msra.mxu1 %v3030_v33  ;;  %v3405_v49 = vld [vmem:[%s3394_s2] sm:$0xff] }
  0x25   : > { %2824 = vmatpush3.bf16.msra.mxu0 %v3026_v13  ;;  %2837 = vmatprep.subr.bf16.mxu1 %v3082_v1 }
  0x26   : > { %811 = vrot.lane.b32.xlu1 %v790_v10, %s3974_s7  ;;  %799 = vrot.lane.b32.xlu0 %v790_v10, %s3976_s30 }
  0x27   : > { %2825 = vmatprep.subr.bf16.mxu0 %v3082_v1 }
  0x29   : > { %2826 = vmatpush3.bf16.msra.mxu0 %v3027_v14 }
  0x2a   : > { %833 = vrot.lane.b32.xlu1 %v3239_v4, %s3976_s30  ;;  %831 = vrot.lane.b32.xlu0 %v3237_v3, %s3976_s30  ;;  %v3306_v17 = vld [vmem:[#allocation2 + $0x8] sm:$0xff]  ;;  %v3312_v18 = vld [vmem:[#allocation2] sm:$0xff] }
  0x2b   : > { %2827 = vmatprep.subr.bf16.mxu0 %v3082_v1 }
  0x2d   : > { %2828 = vmatpush3.bf16.msra.mxu0 %v3028_v15 }
  0x2e   : > { %845 = vrot.lane.b32.xlu1 %v3239_v4, %s3974_s7  ;;  %843 = vrot.lane.b32.xlu0 %v3237_v3, %s3974_s7 }
  0x2f   : > { %2829 = vmatprep.subr.bf16.mxu0 %v3082_v1 }
  0x31   : > { %2830 = vmatpush3.bf16.msra.mxu0 %v3029_v16 }
  0x32   : > { %867 = vrot.lane.b32.xlu1 %v3267_v12, %s3976_s30  ;;  %865 = vrot.lane.b32.xlu0 %v3263_v11, %s3976_s30 }
  0x33   : > { %2855 = vmatprep.subr.bf16.mxu0 %v3082_v1 }
  0x36   : > { %879 = vrot.lane.b32.xlu1 %v3267_v12, %s3974_s7  ;;  %877 = vrot.lane.b32.xlu0 %v3263_v11, %s3974_s7 }
  0x3a   : > { %1034 = vrot.lane.b32.xlu1 %v3306_v17, %s3976_s30  ;;  %1032 = vrot.lane.b32.xlu0 %v3312_v18, %s3976_s30 }
  0x3e   : > { %1046 = vrot.lane.b32.xlu1 %v3306_v17, %s3974_s7  ;;  %1044 = vrot.lane.b32.xlu0 %v3312_v18, %s3974_s7 }
  0x42   : > { %1068 = vrot.lane.b32.xlu1 %v3261_v8, %s3976_s30  ;;  %1066 = vrot.lane.b32.xlu0 %v3254_v6, %s3976_s30 }
  0x46   : > { %1080 = vrot.lane.b32.xlu1 %v3261_v8, %s3974_s7  ;;  %1078 = vrot.lane.b32.xlu0 %v3254_v6, %s3974_s7 }
  0x94   : > { %v810_v29 = vpop.permute.xlu1 %809  ;;  %v798_v30 = vpop.permute.xlu0 %797 }
  0x95   : > { %v805_v32 = vmul.f32 %v804_v26, %v798_v30  ;;  %v817_v38 = vmul.f32 %v816_v31, %v810_v29 }
  0x97   : > { %v807_v34 = vadd.f32 %v805_v32, %v795_v27  ;;  %v2612_v32 = vld [vmem:[%s3994_s4] ss:$0 sm:$0xff]  ;;  %s3997_s4 = sld [smem:[#allocation11_spill]] }
  0x98   : > { %v812_v36 = vpop.permute.xlu1 %811  ;;  %v800_v37 = vpop.permute.xlu0 %799 }
  0x99   : > { %v806_v39 = vmul.f32 %v804_v26, %v800_v37  ;;  %v819_v43 = vadd.f32 %v817_v38, %v807_v34  ;;  %v818_v44 = vmul.f32 %v816_v31, %v812_v36  ;;  %v3369_v37 = vld [vmem:[#allocation2 + $0x2] sm:$0xff] }
  0x9b   : > { %v808_v45 = vadd.f32 %v806_v39, %v796_v35  ;;  %v829_v55 = vadd.f32 %v827_v42, %v819_v43  ;;  %v3031_v42 = vld [vmem:[%s3954_s9 + $0x48] sm:$0xff]  }
  0x9c   : > { %v834_v47 = vpop.permute.xlu1 %833  ;;  %v832_v48 = vpop.permute.xlu0 %831  ;;  %v3377_v43 = vld [vmem:[#allocation2 + $0xa] sm:$0xff]  ;;  %2838 = vmatpush3.bf16.msra.mxu1 %v3031_v42 }
  0x9d   : > { %v820_v50 = vadd.f32 %v818_v44, %v808_v45  ;;  %v839_v51 = vmul.f32 %v838_v40, %v832_v48  ;;  %v840_v54 = vmul.f32 %v838_v40, %v834_v47  ;;  %2839 = vmatprep.subr.bf16.mxu1 %v3082_v1  ;;  %v3032_v45 = vld [vmem:[%s3954_s9 + $0x50] sm:$0xff]   ;;  %v3034_v47 = vld [vmem:[%s3954_s9 + $0x58] sm:$0xff]   ;;  %v3035_v48 = vld [vmem:[%s3954_s9 + $0x8] sm:$0xff]  }
  0x9f   : > { %v830_v53 = vadd.f32 %v828_v46, %v820_v50  ;;  %v841_v62 = vadd.f32 %v839_v51, %v829_v55  ;;  %v3033_v46 = vld [vmem:[%s3954_s9] sm:$0xff]   ;;  %v3408_v50 = vld [vmem:[%s3394_s2 + $0x8] sm:$0xff] }
  0xa0   : > { %v846_v56 = vpop.permute.xlu1 %845  ;;  %v844_v57 = vpop.permute.xlu0 %843  ;;  %2840 = vmatpush3.bf16.msra.mxu1 %v3032_v45  ;;  %v3036_v55 = vld [vmem:[%s3954_s9 + $0x60] sm:$0xff]  }
  0xa1   : > { %v842_v61 = vadd.f32 %v840_v54, %v830_v53  ;;  %v852_v63 = vmul.f32 %v850_v52, %v846_v56  ;;  %v851_v0 = vmul.f32 %v850_v52, %v844_v57  ;;  %2841 = vmatprep.subr.bf16.mxu1 %v3082_v1  ;;  %v3037_v56 = vld [vmem:[%s3954_s9 + $0x10] sm:$0xff]   ;;  %v3038_v57 = vld [vmem:[%s3954_s9 + $0x68] sm:$0xff]  }
  0xa3   : > { %v854_v2 = vadd.f32 %v852_v63, %v842_v61  ;;  %v853_v3 = vadd.f32 %v851_v0, %v841_v62  ;;  %v3042_v61 = vld [vmem:[%s3954_s9 + $0x78] sm:$0xff]   ;;  %v3043_v62 = vld [vmem:[%s3954_s9 + $0x28] sm:$0xff]   ;;  %v3044_v63 = vld [vmem:[%s3954_s9 + $0x30] sm:$0xff]  }
  0xa4   : > { %v868_v4 = vpop.permute.xlu1 %867  ;;  %v866_v5 = vpop.permute.xlu0 %865  ;;  %2842 = vmatpush3.bf16.msra.mxu1 %v3034_v47  ;;  %v3046_v0 = vld [vmem:[%s3954_s9 + $0x38] sm:$0xff]  }
  0xa5   : > { %v864_v9 = vadd.f32 %v862_v58, %v854_v2  ;;  %v874_v10 = vmul.f32 %v872_v59, %v868_v4  ;;  %v863_v13 = vadd.f32 %v861_v60, %v853_v3  ;;  %v873_v14 = vmul.f32 %v872_v59, %v866_v5  ;;  %2843 = vmatprep.subr.bf16.mxu1 %v3082_v1  ;;  %v3039_v58 = vld [vmem:[%s3954_s9 + $0x18] sm:$0xff]   ;;  %v3040_v59 = vld [vmem:[%s3954_s9 + $0x70] sm:$0xff]   ;;  %v3041_v60 = vld [vmem:[%s3954_s9 + $0x20] sm:$0xff]  }
  0xa7   : > { %v876_v16 = vadd.f32 %v874_v10, %v864_v9  ;;  %v875_v19 = vadd.f32 %v873_v14, %v863_v13 }
  0xa8   : > { %v880_v15 = vpop.permute.xlu1 %879  ;;  %v878_v12 = vpop.permute.xlu0 %877  ;;  %2844 = vmatpush3.bf16.msra.mxu1 %v3036_v55 }
  0xa9   : > { %v886_v20 = vmul.f32 %v884_v7, %v880_v15  ;;  %v885_v11 = vmul.f32 %v884_v7, %v878_v12  ;;  %2845 = vmatprep.subr.bf16.mxu1 %v3082_v1  ;;  %v1018_v12 = vld [vmem:[%s3997_s4] sm:$0x7] }
  0xaa   : > { %v1051_v33 = vrot.slane %v1018_v12, %v3338_v25 }
  0xab   : > { %v888_v24 = vadd.f32 %v886_v20, %v876_v16  ;;  %v887_v26 = vadd.f32 %v885_v11, %v875_v19  ;;  %v2622_v19 = vld [vmem:[%s3997_s4 + $0xc] sm:$0x7]  ;;  %v1029_v11 = vrot.slane %v1018_v12, %v3330_v21 }
  0xac   : > { %2846 = vmatpush3.bf16.msra.mxu1 %v3038_v57  ;;  %v1033_v7 = vpop.permute.xlu0 %1032  ;;  %v1035_v9 = vpop.permute.xlu1 %1034  ;;  %v1176_v20 = vrot.slane %v2622_v19, %v3335_v23 }
  0xad   : > { %v896_v27 = vadd.f32 %v2611_v22, %v888_v24  ;;  %v895_v28 = vadd.f32 %v2611_v22, %v887_v26  ;;  %2847 = vmatprep.subr.bf16.mxu1 %v3082_v1  ;;  %v1039_v22 = vrot.slane %v1018_v12, %v3335_v23  ;;  %v1166_v26 = vrot.slane %v2622_v19, %v3330_v21 }
  0xaf   : > { %v898_v29 = vmax.f32 %v896_v27, 0.0  ;;  %v897_v30 = vmax.f32 %v895_v28, 0.0  ;;  %v2623_v28 = vld [vmem:[%s3997_s4 + $0x10] sm:$0x7]  ;;  %v1041_v42 = vmul.f32 %v1039_v22, %v1035_v9 }
  0xb0   : > { %2848 = vmatpush3.bf16.msra.mxu1 %v3040_v59  ;;  %v1045_v10 = vpop.permute.xlu0 %1044  ;;  %v1047_v13 = vpop.permute.xlu1 %1046  ;;  %v1222_v12 = vrot.slane %v2623_v28, %v3338_v25 }
  0xb1   : > { %v899_v31 = vpack.c.bf16 %v898_v29, %v897_v30  ;;  %2849 = vmatprep.subr.bf16.mxu1 %v3082_v1  ;;  %v1188_v30 = vrot.slane %v2622_v19, %v3338_v25 }
  0xb3   : > { %2832 = vmatmul.mubr.bf16.vlgmr.msra.gmra.mrb[0].mxu0 %v899_v31  ;;  %v1030_v31 = vmul.f32 %v1029_v11, %v3312_v18 }
  0xb4   : > { %2871 = vmatprep.mubr.msk.bf16.mxu0 %vm3085_vm0, %v3082_v1  ;;  %2856 = vmatpush3.bf16.msra.mxu0 %v3033_v46  ;;  %v1067_v14 = vpop.permute.xlu0 %1066  ;;  %v3525_v15 = vpop.permute.xlu1 %1068 }
  0xb5   : > { %2857 = vmatprep.subr.bf16.mxu0 %v3082_v1  ;;  %2850 = vmatpush3.bf16.msra.mxu1 %v3042_v61 }
  0xb6   : > { %2875 = vmatprep.subr.bf16.mxu1 %v3082_v1 }
  0xb8   : > { %2858 = vmatpush3.bf16.msra.mxu0 %v3035_v48  ;;  %v3530_v16 = vpop.permute.xlu0 %1078  ;;  %v3538_v24 = vpop.permute.xlu1 %1080  ;;  %v1210_v48 = vrot.slane %v2623_v28, %v3335_v23 }
  0xb9   : > { %2859 = vmatprep.subr.bf16.mxu0 %v3082_v1 }
  0xbc   : > { %2860 = vmatpush3.bf16.msra.mxu0 %v3037_v56  ;;  %v1052_v56 = vmul.f32 %v1051_v33, %v1045_v10 }
  0xbd   : > { %2861 = vmatprep.subr.bf16.mxu0 %v3082_v1 }
  0xc0   : > { %2862 = vmatpush3.bf16.msra.mxu0 %v3039_v58 }
  0xc1   : > { %2863 = vmatprep.subr.bf16.mxu0 %v3082_v1 }
  0xc4   : > { %2864 = vmatpush3.bf16.msra.mxu0 %v3041_v60 }
  0xc5   : > { %2865 = vmatprep.subr.bf16.mxu0 %v3082_v1 }
  0xc8   : > { %2866 = vmatpush3.bf16.msra.mxu0 %v3043_v62 }
  0xc9   : > { %2867 = vmatprep.subr.bf16.mxu0 %v3082_v1 }
  0xcc   : > { %2868 = vmatpush3.bf16.msra.mxu0 %v3044_v63 }
  0xcd   : > { %2869 = vmatprep.subr.bf16.mxu0 %v3082_v1 }
  0xd0   : > { %2870 = vmatpush3.bf16.msra.mxu0 %v3046_v0 }
 0x186   : > { %v1005_v34 = vpop.f32.mrb[0].mxu0 }
 0x187   : > { %v1006_v35 = vadd.f32 %v2612_v32, %v1005_v34  ;;  %v2833_v36 = vpop.f32.mrb[1].mxu0 }
 0x188   : > { %v1008_v38 = vpop.f32.mrb[2].mxu0 }
 0x189   : > { %v3372_v39 = vmax.f32 %v1006_v35, 0.0  ;;  %v1009_v40 = vadd.f32 %v2612_v32, %v1008_v38  ;;  %v2834_v41 = vpop.f32.mrb[3].mxu0  ;;  %v1040_v32 = vmul.f32 %v1039_v22, %v1033_v7  ;;  %v1019_v35 = vld [vmem:[%s3997_s4 + $0x4] sm:$0x7] }
 0x18a   : > { %v1031_v41 = vmul.f32 %v1029_v11, %v3306_v17  ;;  %v1061_v57 = vrot.slane %v1019_v35, %v3330_v21  ;;  %v1053_v17 = vmul.f32 %v1051_v33, %v1047_v13 }
 0x18b   : > { %v3379_v44 = vmax.f32 %v1009_v40, 0.0  ;;  %1159 = vst [vmem:[#allocation2 + $0x1] sm:$0xff] %v3372_v39  ;;  %v1198_v40 = vrot.slane %v2623_v28, %v3330_v21  ;;  %v1042_v55 = vadd.f32 %v1040_v32, %v1030_v31 }
 0x18c   : > { %v1043_v62 = vadd.f32 %v1041_v42, %v1031_v41  ;;  %v1062_v11 = vmul.f32 %v1061_v57, %v3254_v6 }
 0x18d   : > { %1160 = vst [vmem:[#allocation2 + $0x9] sm:$0xff] %v3379_v44  ;;  %v1199_v61 = vmul.f32 %v1198_v40, %v3372_v39  ;;  %v1200_v0 = vmul.f32 %v1198_v40, %v3379_v44  ;;  %v1054_v19 = vadd.f32 %v1052_v56, %v1042_v55 }
 0x192   : > { %v3410_v51 = vld [vmem:[#allocation2] sm:$0xff] }
 0x193   : > { %1169 = vrot.lane.b32.xlu0 %v3410_v51, %s3976_s30  ;;  %v1167_v36 = vmul.f32 %v1166_v26, %v3410_v51 }
 0x194   : > { %v3414_v52 = vld [vmem:[#allocation2 + $0x8] sm:$0xff] }
 0x195   : > { %v3416_v53 = vld [vmem:[#allocation2 + $0x2] sm:$0xff]  ;;  %v3418_v54 = vld [vmem:[#allocation2 + $0xa] sm:$0xff]  ;;  %1171 = vrot.lane.b32.xlu1 %v3414_v52, %s3976_s30  ;;  %v1168_v18 = vmul.f32 %v1166_v26, %v3414_v52 }
 0x196   : > { %1475 = vst [vmem:[#allocation2 + $0x1] sm:$0xff] %v3405_v49  ;;  %1476 = vst [vmem:[#allocation2 + $0x9] sm:$0xff] %v3408_v50 }
 0x197   : > { %1181 = vrot.lane.b32.xlu0 %v3410_v51, %s3996_s28 }
 0x199   : > { %1183 = vrot.lane.b32.xlu1 %v3414_v52, %s3996_s28  ;;  %v2624_v52 = vld [vmem:[%s3997_s4 + $0x14] sm:$0x7] }
 0x19b   : > { %1203 = vrot.lane.b32.xlu0 %v3372_v39, %s3976_s30 }
 0x19d   : > { %1205 = vrot.lane.b32.xlu1 %v3379_v44, %s3976_s30  ;;  %v3491_v2 = vld [vmem:[#allocation2] sm:$0xff]  ;;  %v3495_v3 = vld [vmem:[#allocation2 + $0x8] sm:$0xff] }
 0x19e   : > { %v3511_v4 = vld [vmem:[#allocation2 + $0x2] sm:$0xff]  ;;  %v3515_v5 = vld [vmem:[#allocation2 + $0xa] sm:$0xff] }
 0x19f   : > { %1215 = vrot.lane.b32.xlu0 %v3372_v39, %s3996_s28 }
 0x1a1   : > { %1217 = vrot.lane.b32.xlu1 %v3379_v44, %s3996_s28 }
 0x1a3   : > { %1237 = vrot.lane.b32.xlu0 %v3416_v53, %s3976_s30 }
 0x1a5   : > { %1239 = vrot.lane.b32.xlu1 %v3418_v54, %s3976_s30 }
 0x1a7   : > { %1249 = vrot.lane.b32.xlu0 %v3416_v53, %s3996_s28 }
 0x1a9   : > { %1251 = vrot.lane.b32.xlu1 %v3418_v54, %s3996_s28 }
 0x1ab   : > { %1100 = vrot.lane.b32.xlu0 %v3369_v37, %s3976_s30 }
 0x1ad   : > { %1102 = vrot.lane.b32.xlu1 %v3377_v43, %s3976_s30 }
 0x1af   : > { %1112 = vrot.lane.b32.xlu0 %v3369_v37, %s3996_s28 }
 0x1b1   : > { %1114 = vrot.lane.b32.xlu1 %v3377_v43, %s3996_s28 }
 0x1b3   : > { %1485 = vrot.lane.b32.xlu0 %v3491_v2, %s3976_s30 }
 0x1b5   : > { %1487 = vrot.lane.b32.xlu1 %v3495_v3, %s3976_s30 }
 0x1b7   : > { %1497 = vrot.lane.b32.xlu0 %v3491_v2, %s3996_s28 }
 0x1b9   : > { %1499 = vrot.lane.b32.xlu1 %v3495_v3, %s3996_s28 }
 0x1bb   : > { %1519 = vrot.lane.b32.xlu0 %v3405_v49, %s3976_s30 }
 0x1bd   : > { %1521 = vrot.lane.b32.xlu1 %v3408_v50, %s3976_s30 }
 0x1bf   : > { %1531 = vrot.lane.b32.xlu0 %v3405_v49, %s3996_s28 }
 0x1c1   : > { %1533 = vrot.lane.b32.xlu1 %v3408_v50, %s3996_s28 }
 0x1c3   : > { %1553 = vrot.lane.b32.xlu0 %v3511_v4, %s3976_s30 }
 0x1c5   : > { %1555 = vrot.lane.b32.xlu1 %v3515_v5, %s3976_s30 }
 0x1c7   : > { %1565 = vrot.lane.b32.xlu0 %v3511_v4, %s3996_s28 }
 0x1c9   : > { %1567 = vrot.lane.b32.xlu1 %v3515_v5, %s3996_s28 }
 0x205   : > { %v1170_v27 = vpop.permute.xlu0 %1169 }
 0x206   : > { %v1177_v29 = vmul.f32 %v1176_v20, %v1170_v27  ;;  %v1232_v27 = vrot.slane %v2624_v52, %v3330_v21 }
 0x207   : > { %v1172_v34 = vpop.permute.xlu1 %1171 }
 0x208   : > { %v1178_v38 = vmul.f32 %v1176_v20, %v1172_v34  ;;  %v1179_v46 = vadd.f32 %v1177_v29, %v1167_v36  ;;  %v1073_v20 = vrot.slane %v1019_v35, %v3335_v23  ;;  %v1055_v29 = vadd.f32 %v1053_v17, %v1043_v62 }
 0x209   : > { %v1182_v45 = vpop.permute.xlu0 %1181  ;;  %v1244_v34 = vrot.slane %v2624_v52, %v3335_v23  ;;  %v1064_v36 = vadd.f32 %v1062_v11, %v1054_v19 }
 0x20a   : > { %v1189_v47 = vmul.f32 %v1188_v30, %v1182_v45  ;;  %v1180_v59 = vadd.f32 %v1178_v38, %v1168_v18  ;;  %v1074_v28 = vmul.f32 %v1073_v20, %v1067_v14  ;;  %v1085_v38 = vrot.slane %v1019_v35, %v3338_v25 }
 0x20b   : > { %v1184_v58 = vpop.permute.xlu1 %1183  ;;  %v1233_v45 = vmul.f32 %v1232_v27, %v3416_v53  ;;  %v1075_v18 = vmul.f32 %v1073_v20, %v3525_v15  ;;  %v1256_v35 = vrot.slane %v2624_v52, %v3338_v25  ;;  %v2626_v52 = vld [vmem:[%s3998_s1 + $0x1] ss:$0 sm:$0xff] }
 0x20c   : > { %v1191_v51 = vadd.f32 %v1189_v47, %v1179_v46  ;;  %v1190_v60 = vmul.f32 %v1188_v30, %v1184_v58  ;;  %v1063_v30 = vmul.f32 %v1061_v57, %v3261_v8  ;;  %v1234_v8 = vmul.f32 %v1232_v27, %v3418_v54 }
 0x20d   : > { %v1204_v63 = vpop.permute.xlu0 %1203  ;;  %v1076_v57 = vadd.f32 %v1074_v28, %v1064_v36  ;;  %v1086_v58 = vmul.f32 %v1085_v38, %v3530_v16  ;;  %v1087_v54 = vmul.f32 %v1085_v38, %v3538_v24  ;;  %v2659_v24 = vld [vmem:[%s3997_s4 + $0x18] sm:$0x7] }
 0x20e   : > { %v1192_v7 = vadd.f32 %v1190_v60, %v1180_v59  ;;  %v1201_v9 = vadd.f32 %v1199_v61, %v1191_v51  ;;  %v1211_v10 = vmul.f32 %v1210_v48, %v1204_v63  ;;  %v1065_v46 = vadd.f32 %v1063_v30, %v1055_v29 }
 0x20f   : > { %v1206_v22 = vpop.permute.xlu1 %1205  ;;  %v1482_v30 = vrot.slane %v2659_v24, %v3330_v21  ;;  %v1492_v36 = vrot.slane %v2659_v24, %v3335_v23 }
 0x210   : > { %v1202_v26 = vadd.f32 %v1200_v0, %v1192_v7  ;;  %v1212_v13 = vmul.f32 %v1210_v48, %v1206_v22  ;;  %v1213_v32 = vadd.f32 %v1211_v10, %v1201_v9  ;;  %v1020_v48 = vld [vmem:[%s3997_s4 + $0x8] sm:$0x7]  ;;  %v1077_v60 = vadd.f32 %v1075_v18, %v1065_v46  ;;  %v3045_v46 = vld [vmem:[%s3954_s9 + $0x80] sm:$0xff]  }
 0x211   : > { %v1216_v31 = vpop.permute.xlu0 %1215  ;;  %v1095_v15 = vrot.slane %v1020_v48, %v3330_v21  ;;  %v1107_v63 = vrot.slane %v1020_v48, %v3335_v23  ;;  %v1088_v0 = vadd.f32 %v1086_v58, %v1076_v57  ;;  %v1119_v27 = vrot.slane %v1020_v48, %v3338_v25 }
 0x212   : > { %v1223_v33 = vmul.f32 %v1222_v12, %v1216_v31  ;;  %v1214_v41 = vadd.f32 %v1212_v13, %v1202_v26  ;;  %v1089_v19 = vadd.f32 %v1087_v54, %v1077_v60  ;;  %v1504_v58 = vrot.slane %v2659_v24, %v3338_v25 }
 0x213   : > { %v1218_v40 = vpop.permute.xlu1 %1217  ;;  %v1097_v11 = vmul.f32 %v1095_v15, %v3377_v43  ;;  %v2660_v43 = vld [vmem:[%s3997_s4 + $0x1c] sm:$0x7] }
 0x214   : > { %v1225_v6 = vadd.f32 %v1223_v33, %v1213_v32  ;;  %v1224_v42 = vmul.f32 %v1222_v12, %v1218_v40  ;;  %v1096_v12 = vmul.f32 %v1095_v15, %v3369_v37  ;;  %v1484_v15 = vmul.f32 %v1482_v30, %v3495_v3  ;;  %v2661_v3 = vld [vmem:[%s3997_s4 + $0x20] sm:$0x7] }
 0x215   : > { %v1238_v47 = vpop.permute.xlu0 %1237  ;;  %v1099_v37 = vadd.f32 %v1097_v11, %v1089_v19  ;;  %v1538_v19 = vrot.slane %v2660_v43, %v3338_v25 }
 0x216   : > { %v1226_v55 = vadd.f32 %v1224_v42, %v1214_v41  ;;  %v1235_v14 = vadd.f32 %v1233_v45, %v1225_v6  ;;  %v1245_v56 = vmul.f32 %v1244_v34, %v1238_v47  ;;  %v1098_v32 = vadd.f32 %v1096_v12, %v1088_v0  ;;  %v2621_v6 = vld [vmem:[%s3998_s1] ss:$0 sm:$0xff] }
 0x217   : > { %v1240_v59 = vpop.permute.xlu1 %1239  ;;  %v1483_v45 = vmul.f32 %v1482_v30, %v3491_v2  ;;  %v3047_v2 = vld [vmem:[%s3954_s9 + $0x88] sm:$0xff]   ;;  %v1526_v0 = vrot.slane %v2660_v43, %v3335_v23 }
 0x218   : > { %v1236_v53 = vadd.f32 %v1234_v8, %v1226_v55  ;;  %v1246_v51 = vmul.f32 %v1244_v34, %v1240_v59  ;;  %v1247_v62 = vadd.f32 %v1245_v56, %v1235_v14  ;;  %v1514_v14 = vrot.slane %v2660_v43, %v3330_v21 }
 0x219   : > { %v1250_v61 = vpop.permute.xlu0 %1249 }
 0x21a   : > { %v1257_v17 = vmul.f32 %v1256_v35, %v1250_v61  ;;  %v1248_v16 = vadd.f32 %v1246_v51, %v1236_v53  ;;  %v1515_v61 = vmul.f32 %v1514_v14, %v3405_v49 }
 0x21b   : > { %v1252_v7 = vpop.permute.xlu1 %1251 }
 0x21c   : > { %v1259_v9 = vadd.f32 %v1257_v17, %v1247_v62  ;;  %v1258_v10 = vmul.f32 %v1256_v35, %v1252_v7  ;;  %v1516_v7 = vmul.f32 %v1514_v14, %v3408_v50 }
 0x21d   : > { %v1101_v20 = vpop.permute.xlu0 %1100 }
 0x21e   : > { %v1267_v22 = vadd.f32 %v2626_v52, %v1259_v9  ;;  %v1260_v26 = vadd.f32 %v1258_v10, %v1248_v16  ;;  %v1108_v13 = vmul.f32 %v1107_v63, %v1101_v20  ;;  %v3048_v16 = vld [vmem:[%s3954_s9 + $0x90] sm:$0xff]  }
 0x21f   : > { %v1103_v29 = vpop.permute.xlu1 %1102 }
 0x220   : > { %v1268_v31 = vadd.f32 %v2626_v52, %v1260_v26  ;;  %v1109_v33 = vmul.f32 %v1107_v63, %v1103_v29  ;;  %v1269_v28 = vmax.f32 %v1267_v22, 0.0  ;;  %v1110_v40 = vadd.f32 %v1108_v13, %v1098_v32  ;;  %v3049_v13 = vld [vmem:[%s3954_s9 + $0x98] sm:$0xff]  }
 0x221   : > { %v1113_v34 = vpop.permute.xlu0 %1112  ;;  %v1548_v22 = vrot.slane %v2661_v3, %v3330_v21 }
 0x222   : > { %v1270_v38 = vmax.f32 %v1268_v31, 0.0  ;;  %v1120_v41 = vmul.f32 %v1119_v27, %v1113_v34  ;;  %v1111_v18 = vadd.f32 %v1109_v33, %v1099_v37  ;;  %v1560_v37 = vrot.slane %v2661_v3, %v3335_v23 }
 0x223   : > { %v1115_v42 = vpop.permute.xlu1 %1114  ;;  %v1549_v33 = vmul.f32 %v1548_v22, %v3511_v4  ;;  %v1572_v4 = vrot.slane %v2661_v3, %v3338_v25  ;;  %v1718_v3 = vld [vmem:[%s3956_s11 + $0x20] sm:$0xff] }
 0x224   : > { %v1122_v47 = vadd.f32 %v1120_v41, %v1110_v40  ;;  %v1121_v8 = vmul.f32 %v1119_v27, %v1115_v42  ;;  %v1271_v48 = vpack.c.bf16 %v1270_v38, %v1269_v28  ;;  %v1550_v41 = vmul.f32 %v1548_v22, %v3515_v5  ;;  %v2663_v5 = vld [vmem:[%s3998_s1 + $0x2] ss:$0 sm:$0xff]  ;;  %v1725_v22 = vld [vmem:[%s3956_s11 + $0x58] sm:$0xff] }
 0x225   : > { %v1486_v55 = vpop.permute.xlu0 %1485 }
 0x226   : > { %v1130_v56 = vadd.f32 %v2621_v6, %v1122_v47  ;;  %v1123_v35 = vadd.f32 %v1121_v8, %v1111_v18  ;;  %v1493_v57 = vmul.f32 %v1492_v36, %v1486_v55  ;;  %2852 = vmatmul.mubr.bf16.vlgmr.msra.gmra.mrb[0].mxu1 %v1271_v48  ;;  %v3051_v18 = vld [vmem:[%s3954_s9 + $0xa8] sm:$0xff]  }
 0x227   : > { %v1488_v59 = vpop.permute.xlu1 %1487  ;;  %2876 = vmatpush3.bf16.msra.mxu1 %v3045_v46  ;;  %2891 = vmatprep.mubr.msk.bf16.mxu1 %vm3085_vm0, %v3082_v1 }
 0x228   : > { %v1131_v53 = vadd.f32 %v2621_v6, %v1123_v35  ;;  %v1495_v51 = vadd.f32 %v1493_v57, %v1483_v45  ;;  %v1494_v60 = vmul.f32 %v1492_v36, %v1488_v59  ;;  %2877 = vmatprep.subr.bf16.mxu1 %v3082_v1  ;;  %v1132_v62 = vmax.f32 %v1130_v56, 0.0  ;;  %v3050_v36 = vld [vmem:[%s3954_s9 + $0xa0] sm:$0xff]   ;;  %v3052_v35 = vld [vmem:[%s3954_s9 + $0xb0] sm:$0xff]  }
 0x229   : > { %v1498_v54 = vpop.permute.xlu0 %1497 }
 0x22a   : > { %v1133_v17 = vmax.f32 %v1131_v53, 0.0  ;;  %v1505_v63 = vmul.f32 %v1504_v58, %v1498_v54  ;;  %v1496_v10 = vadd.f32 %v1494_v60, %v1484_v15 }
 0x22b   : > { %v1500_v52 = vpop.permute.xlu1 %1499  ;;  %2878 = vmatpush3.bf16.msra.mxu1 %v3047_v2 }
 0x22c   : > { %v1134_v9 = vpack.c.bf16 %v1133_v17, %v1132_v62  ;;  %v1507_v49 = vadd.f32 %v1505_v63, %v1495_v51  ;;  %v1506_v12 = vmul.f32 %v1504_v58, %v1500_v52  ;;  %2879 = vmatprep.subr.bf16.mxu1 %v3082_v1  ;;  %v3053_v51 = vld [vmem:[%s3954_s9 + $0xb8] sm:$0xff]   ;;  %v1714_v62 = vld [vmem:[%s3956_s11] sm:$0xff]  ;;  %v1715_v17 = vld [vmem:[%s3956_s11 + $0x8] sm:$0xff] }
 0x22d   : > { %v1520_v24 = vpop.permute.xlu0 %1519  ;;  %v1716_v63 = vld [vmem:[%s3956_s11 + $0x10] sm:$0xff]  ;;  %v2986_v52 = vpack.c.bf16 %v1715_v17, %v1714_v62  ;;  %v1884_v17 = vld [vmem:[%s3962_s17] sm:$0x3] }
 0x22e   : > { %v1508_v20 = vadd.f32 %v1506_v12, %v1496_v10  ;;  %v1517_v11 = vadd.f32 %v1515_v61, %v1507_v49  ;;  %v1527_v50 = vmul.f32 %v1526_v0, %v1520_v24  ;;  %2872 = vmatmul.mubr.bf16.vlgmr.msra.gmra.mrb[4].mxu0 %v1134_v9  ;;  %v1719_v9 = vld [vmem:[%s3956_s11 + $0x28] sm:$0xff]  ;;  %v1720_v49 = vld [vmem:[%s3956_s11 + $0x30] sm:$0xff]  ;;  %v1721_v12 = vld [vmem:[%s3956_s11 + $0x38] sm:$0xff] }
 0x22f   : > { %v1522_v26 = vpop.permute.xlu1 %1521  ;;  %2880 = vmatpush3.bf16.msra.mxu1 %v3048_v16  ;;  %2927 = vmatprep.mubr.msk.f32.mxu0 %vm3085_vm0, %v3082_v1  ;;  %v2992_v10 = vpack.c.bf16 %v1719_v9, %v1718_v3  ;;  %v2995_v24 = vpack.c.bf16 %v1721_v12, %v1720_v49  ;;  %v1881_v9 = vld [vmem:[%s3961_s16] sm:$0x1] }
 0x230   : > { %v1518_v27 = vadd.f32 %v1516_v7, %v1508_v20  ;;  %v1528_v29 = vmul.f32 %v1526_v0, %v1522_v26  ;;  %2881 = vmatprep.subr.bf16.mxu1 %v3082_v1  ;;  %v1529_v31 = vadd.f32 %v1527_v50, %v1517_v11  ;;  %v3086_v0 = vmov 0.0|0.0   ;;  %v1717_v7 = vld [vmem:[%s3956_s11 + $0x18] sm:$0xff]  ;;  %v1723_v20 = vld [vmem:[%s3956_s11 + $0x48] sm:$0xff]  ;;  %v1724_v50 = vld [vmem:[%s3956_s11 + $0x50] sm:$0xff] }
 0x231   : > { %v1532_v30 = vpop.permute.xlu0 %1531  ;;  %2985 = vmatprep.subr.bf16.mxu0 %v3086_v0  ;;  %v2989_v16 = vpack.c.bf16 %v1717_v7, %v1716_v63  ;;  %v3001_v26 = vpack.c.bf16 %v1725_v22, %v1724_v50  ;;  %v1803_v63 = vld [vmem:[%s3959_s14] sm:$0x1] }
 0x232   : > { %v1539_v32 = vmul.f32 %v1538_v19, %v1532_v30  ;;  %v1530_v28 = vadd.f32 %v1528_v29, %v1518_v27  ;;  %2987 = vmatpush3.bf16.msra.mxu0 %v2986_v52  ;;  %v1727_v27 = vld [vmem:[%s3956_s11 + $0x68] sm:$0xff]  ;;  %v1728_v30 = vld [vmem:[%s3956_s11 + $0x70] sm:$0xff] }
 0x233   : > { %v1534_v34 = vpop.permute.xlu1 %1533  ;;  %2882 = vmatpush3.bf16.msra.mxu1 %v3049_v13  ;;  %2988 = vmatprep.subr.bf16.mxu0 %v3086_v0  ;;  %v1726_v13 = vld [vmem:[%s3956_s11 + $0x60] sm:$0xff] }
 0x234   : > { %v1541_v38 = vadd.f32 %v1539_v32, %v1529_v31  ;;  %v1540_v40 = vmul.f32 %v1538_v19, %v1534_v34  ;;  %2883 = vmatprep.subr.bf16.mxu1 %v3082_v1  ;;  %v1722_v19 = vld [vmem:[%s3956_s11 + $0x40] sm:$0xff]  ;;  %v3004_v29 = vpack.c.bf16 %v1727_v27, %v1726_v13  ;;  %v1729_v31 = vld [vmem:[%s3956_s11 + $0x78] sm:$0xff] }
 0x235   : > { %v1554_v43 = vpop.permute.xlu0 %1553  ;;  %v2998_v11 = vpack.c.bf16 %v1723_v20, %v1722_v19  ;;  %v3007_v32 = vpack.c.bf16 %v1729_v31, %v1728_v30  ;;  %v1885_v19 = vld [vmem:[%s3963_s18] sm:$0x1] }
 0x236   : > { %v1542_v6 = vadd.f32 %v1540_v40, %v1530_v28  ;;  %v1551_v42 = vadd.f32 %v1549_v33, %v1541_v38  ;;  %v1561_v45 = vmul.f32 %v1560_v37, %v1554_v43  ;;  %2990 = vmatpush3.bf16.msra.mxu0 %v2989_v16  ;;  %v1802_v33 = vld [vmem:[%s3958_s13] sm:$0xff] }
 0x237   : > { %v1556_v46 = vpop.permute.xlu1 %1555  ;;  %2884 = vmatpush3.bf16.msra.mxu1 %v3050_v36  ;;  %2991 = vmatprep.subr.bf16.mxu0 %v3086_v0  ;;  %v1879_v16 = vld [vmem:[%s3960_s15] sm:$0x1] }
 0x238   : > { %v1552_v47 = vadd.f32 %v1550_v41, %v1542_v6  ;;  %v1562_v8 = vmul.f32 %v1560_v37, %v1556_v46  ;;  %2885 = vmatprep.subr.bf16.mxu1 %v3082_v1  ;;  %v1563_v55 = vadd.f32 %v1561_v45, %v1551_v42  ;;  %v3054_v31 = vld [vmem:[%s3967_s22] sm:$0xff]  }
 0x239   : > { %v1566_v48 = vpop.permute.xlu0 %1565 }
 0x23a   : > { %v1573_v14 = vmul.f32 %v1572_v4, %v1566_v48  ;;  %v1564_v57 = vadd.f32 %v1562_v8, %v1552_v47  ;;  %2993 = vmatpush3.bf16.msra.mxu0 %v2992_v10 }
 0x23b   : > { %v1568_v56 = vpop.permute.xlu1 %1567  ;;  %2886 = vmatpush3.bf16.msra.mxu1 %v3051_v18  ;;  %2994 = vmatprep.subr.bf16.mxu0 %v3086_v0 }
 0x23c   : > { %v1575_v58 = vadd.f32 %v1573_v14, %v1563_v55  ;;  %v1574_v59 = vmul.f32 %v1572_v4, %v1568_v56  ;;  %2887 = vmatprep.subr.bf16.mxu1 %v3082_v1  ;;  %v2688_v4 = vld [vmem:[%s3955_s10] ss:$0 sm:$0xff] }
 0x23e   : > { %v1583_v2 = vadd.f32 %v2663_v5, %v1575_v58  ;;  %v1576_v53 = vadd.f32 %v1574_v59, %v1564_v57  ;;  %2996 = vmatpush3.bf16.msra.mxu0 %v2995_v24  ;;  %v1971_v24 = vld [vmem:[%s3964_s19] sm:$0xff] }
 0x23f   : > { %2888 = vmatpush3.bf16.msra.mxu1 %v3052_v35  ;;  %2997 = vmatprep.subr.bf16.mxu0 %v3086_v0 }
 0x240   : > { %v1584_v15 = vadd.f32 %v2663_v5, %v1576_v53  ;;  %2889 = vmatprep.subr.bf16.mxu1 %v3082_v1  ;;  %v1585_v60 = vmax.f32 %v1583_v2, 0.0 }
 0x242   : > { %v1586_v54 = vmax.f32 %v1584_v15, 0.0  ;;  %2999 = vmatpush3.bf16.msra.mxu0 %v2998_v11  ;;  %v1730_v15 = vld [vmem:[%s3957_s12] sm:$0x1] }
 0x243   : > { %2890 = vmatpush3.bf16.msra.mxu1 %v3053_v51  ;;  %3000 = vmatprep.subr.bf16.mxu0 %v3086_v0 }
 0x244   : > { %v1587_v61 = vpack.c.bf16 %v1586_v54, %v1585_v60  ;;  %2930 = vmatprep.subr.mxu1 %v3082_v1 }
 0x246   : > { %2892 = vmatmul.mubr.bf16.vlgmr.msra.gmra.mrb[4].mxu1 %v1587_v61  ;;  %3002 = vmatpush3.bf16.msra.mxu0 %v3001_v26 }
 0x247   : > { %2932 = vmatprep.mubr.msk.f32.mxu1 %vm3085_vm0, %v3082_v1  ;;  %3003 = vmatprep.subr.bf16.mxu0 %v3086_v0 }
 0x248   : > { %2931 = vmatpush3.msra.mxu1 %v1802_v33  ;;  %v2046_v33 = vld [vmem:[%s3247_s26 + $0x8] sm:$0xff] }
 0x249   : > { %2935 = vmatprep.subr.mxu1 %v3082_v1 }
 0x24a   : > { %3005 = vmatpush3.bf16.msra.mxu0 %v3004_v29 }
 0x24b   : > { %3006 = vmatprep.subr.bf16.mxu0 %v3086_v0 }
 0x24e   : > { %3008 = vmatpush3.bf16.msra.mxu0 %v3007_v32  ;;  %v2045_v32 = vld [vmem:[%s3247_s26] sm:$0xff] }
 0x24f   : > { %2965 = vmatprep.subr.bf16.mxu0 %v3082_v1 }
 0x2f9   : > { %v1371_v37 = vpop.f32.mrb[0].mxu1 }
 0x2fa   : > { %v2853_v34 = vpop.f32.mrb[1].mxu1 }
 0x2fb   : > { %v1374_v36 = vpop.f32.mrb[2].mxu1  ;;  %v2048_v34 = vld [vmem:[%s3394_s2 + $0x8] sm:$0xff] }
 0x2fc   : > { %v2854_v28 = vpop.f32.mrb[3].mxu1 }
 0x2fd   : > { %v2050_v28 = vadd.f32 %v2048_v34, %v2046_v33  ;;  %v2059_v33 = vld [vmem:[%s3965_s20 + $0x8] sm:$0x7] }
 0x301   : > { %v1460_v38 = vpop.f32.mrb[4].mxu0 }
 0x302   : > { %v1461_v40 = vadd.f32 %v1460_v38, %v1371_v37  ;;  %v2873_v41 = vpop.f32.mrb[5].mxu0  ;;  %v2047_v37 = vld [vmem:[%s3394_s2] sm:$0xff] }
 0x303   : > { %v1463_v43 = vpop.f32.mrb[6].mxu0 }
 0x304   : > { %v1464_v6 = vadd.f32 %v1463_v43, %v1374_v36  ;;  %v2874_v42 = vpop.f32.mrb[7].mxu0  ;;  %v2049_v36 = vadd.f32 %v2047_v37, %v2045_v32  ;;  %v3055_v43 = vld [vmem:[%s3967_s22 + $0x8] sm:$0xff]  }
 0x319   : > { %v1687_v45 = vpop.f32.mrb[4].mxu1 }
 0x31a   : > { %v1694_v46 = vadd.f32 %v1687_v45, %v1461_v40  ;;  %v2893_v18 = vpop.f32.mrb[5].mxu1  ;;  %v3056_v45 = vld [vmem:[%s3967_s22 + $0x10] sm:$0xff]  }
 0x31b   : > { %v1690_v47 = vpop.f32.mrb[6].mxu1 }
 0x31c   : > { %v1703_v8 = vadd.f32 %v2688_v4, %v1694_v46  ;;  %v1695_v48 = vadd.f32 %v1690_v47, %v1464_v6  ;;  %v2894_v55 = vpop.f32.mrb[7].mxu1 }
 0x31d   : > { %v3059_v55 = vld [vmem:[%s3967_s22 + $0x28] sm:$0xff]  }
 0x31e   : > { %v1704_v14 = vadd.f32 %v2688_v4, %v1695_v48  ;;  %v1705_v5 = vmax.f32 %v1703_v8, 0.0  ;;  %v3057_v4 = vld [vmem:[%s3967_s22 + $0x18] sm:$0xff]   ;;  %v3058_v48 = vld [vmem:[%s3967_s22 + $0x20] sm:$0xff]  }
 0x320   : > { %v1706_v56 = vmax.f32 %v1704_v14, 0.0  ;;  %v3060_v14 = vld [vmem:[%s3967_s22 + $0x40] sm:$0xff]  }
 0x322   : > { %v1707_v35 = vadd.f32 %v1706_v56, %v1705_v5  ;;  %v3061_v5 = vld [vmem:[%s3967_s22 + $0x30] sm:$0xff]   ;;  %v3062_v56 = vld [vmem:[%s3967_s22 + $0x48] sm:$0xff]  }
 0x324   : > { %v1708_v57 = vrot.slane %v1707_v35, 4 }
 0x326   : > { %v1709_v58 = vadd.f32 %v1708_v57, %v1707_v35  ;;  %v3063_v35 = vld [vmem:[%s3967_s22 + $0x38] sm:$0xff]   ;;  %v3064_v57 = vld [vmem:[%s3967_s22 + $0x50] sm:$0xff]  }
 0x328   : > { %v1710_v59 = vrot.slane %v1709_v58, 2 }
 0x32a   : > { %v1711_v2 = vadd.f32 %v1710_v59, %v1709_v58  ;;  %v3065_v58 = vld [vmem:[%s3967_s22 + $0x58] sm:$0xff]  }
 0x32c   : > { %v1712_v53 = vrot.slane %v1711_v2, 1 }
 0x32e   : > { %v1713_v51 = vadd.f32 %v1712_v53, %v1711_v2  ;;  %v3066_v53 = vld [vmem:[%s3967_s22 + $0x60] sm:$0xff]  }
 0x330   : > { %2928 = vmatmul.mubr.f32.vlgmr.msra.gmra.mrb[8].mxu0 %v1713_v51  ;;  %v3067_v51 = vld [vmem:[%s3967_s22 + $0x68] sm:$0xff]  }
 0x331   : > { %2981 = vmatprep.mubr.msk.bf16.mxu0 %vm3085_vm0, %v3082_v1  ;;  %2966 = vmatpush3.bf16.msra.mxu0 %v3054_v31 }
 0x332   : > { %2967 = vmatprep.subr.bf16.mxu0 %v3082_v1 }
 0x335   : > { %2968 = vmatpush3.bf16.msra.mxu0 %v3055_v43  ;;  %v2146_v43 = vrot.slane %v2059_v33, %v3335_v23 }
 0x336   : > { %2969 = vmatprep.subr.bf16.mxu0 %v3082_v1 }
 0x339   : > { %2970 = vmatpush3.bf16.msra.mxu0 %v3056_v45 }
 0x33a   : > { %2971 = vmatprep.subr.bf16.mxu0 %v3082_v1 }
 0x33d   : > { %2972 = vmatpush3.bf16.msra.mxu0 %v3057_v4 }
 0x33e   : > { %2973 = vmatprep.subr.bf16.mxu0 %v3082_v1 }
 0x341   : > { %2974 = vmatpush3.bf16.msra.mxu0 %v3058_v48 }
 0x342   : > { %2975 = vmatprep.subr.bf16.mxu0 %v3082_v1 }
 0x345   : > { %2976 = vmatpush3.bf16.msra.mxu0 %v3059_v55 }
 0x346   : > { %2977 = vmatprep.subr.bf16.mxu0 %v3082_v1 }
 0x349   : > { %2978 = vmatpush3.bf16.msra.mxu0 %v3061_v5 }
 0x34a   : > { %2979 = vmatprep.subr.bf16.mxu0 %v3082_v1 }
 0x34d   : > { %2980 = vmatpush3.bf16.msra.mxu0 %v3063_v35 }
 0x403   : > { %v1797_v60 = vpop.f32.mrb[8].mxu0 }
 0x404   : > { %v1798_v54 = vadd.f32 %v1797_v60, %v1730_v15  ;;  %v2929_v61 = vpop.f32.mrb[9].mxu0  ;;  %v3068_v15 = vld [vmem:[%s3967_s22 + $0x70] sm:$0xff]   ;;  %v3069_v60 = vld [vmem:[%s3967_s22 + $0x78] sm:$0xff]  }
 0x406   : > { %v1801_v62 = vmax.f32 %v1798_v54, 0.0 }
 0x408   : > { %2933 = vmatmul.mubr.msk.f32.vlgmr.msra.gmra.mrb[8].mxu1 %vm1804_vm1, %v1801_v62 }
 0x409   : > { %2937 = vmatprep.mubr.msk.f32.mxu1 %vm3085_vm0, %v3082_v1  ;;  %2936 = vmatpush3.msk.msra.mxu1 %vm1890_vm2, %v1884_v17 }
 0x40a   : > { %2940 = vmatprep.subr.mxu1 %v3082_v1 }
 0x4db   : > { %v1874_v0 = vpop.f32.mrb[8].mxu1 }
 0x4dc   : > { %v1875_v52 = vadd.f32 %v1874_v0, %v1803_v63  ;;  %v2934_v7 = vpop.f32.mrb[9].mxu1 }
 0x4de   : > { %v1878_v3 = vmax.f32 %v1875_v52, 0.0  ;;  %v2058_v52 = vld [vmem:[%s3965_s20 + $0x4] sm:$0x7] }
 0x4df   : > { %v2124_v32 = vrot.slane %v2058_v52, %v3338_v25 }
 0x4e0   : > { %v1880_v10 = vmul.f32 %v1879_v16, %v1878_v3 }
 0x4e2   : > { %v1882_v49 = vadd.f32 %v1881_v9, %v1880_v10 }
 0x4e4   : > { %v1883_v12 = vmax.f32 %v1882_v49, 0.0  ;;  %v2100_v49 = vrot.slane %v2058_v52, %v3330_v21 }
 0x4e6   : > { %2938 = vmatmul.mubr.msk.f32.vlgmr.msra.gmra.mrb[10].mxu1 %vm1886_vm3, %v1883_v12 }
 0x4e7   : > { %2942 = vmatprep.mubr.msk.f32.mxu1 %vm3085_vm0, %v3082_v1  ;;  %2941 = vmatpush3.msra.mxu1 %v1971_v24 }
 0x4e8   : > { %2945 = vmatprep.subr.bf16.mxu1 %v3082_v1 }
 0x5b9   : > { %v1960_v20 = vpop.f32.mrb[10].mxu1 }
 0x5ba   : > { %v1961_v11 = vadd.f32 %v1960_v20, %v1885_v19  ;;  %v2939_v50 = vpop.f32.mrb[11].mxu1  ;;  %v2112_v19 = vrot.slane %v2058_v52, %v3335_v23 }
 0x5bc   : > { %v1964_v22 = vmax.f32 %v1961_v11, 0.0 }
 0x5be   : > { %v1965_v26 = vsub.f32 0.0, %v1964_v22 }
 0x5c0   : > { %v1966_v13 = vmul.f32 1.442695, %v1965_v26 }
 0x5c2   : > { %3070 = vpow2.f32 %v1966_v13 }
 0x5cc   : > { %v3071_v27 = vpop.eup %3070 }
 0x5cd   : > { %v1968_v29 = vadd.f32 1.0, %v3071_v27 }
 0x5cf   : > { %3072 = vrcp.f32 %v1968_v29 }
 0x5d9   : > { %v3073_v30 = vpop.eup %3072 }
 0x5da   : > { %2943 = vmatmul.mubr.msk.f32.vlgmr.msra.gmra.mrb[12].mxu1 %vm1804_vm1, %v3073_v30 }
 0x5db   : > { %2961 = vmatprep.mubr.msk.bf16.mxu1 %vm3085_vm0, %v3082_v1  ;;  %2946 = vmatpush3.bf16.msra.mxu1 %v3060_v14 }
 0x5dc   : > { %2947 = vmatprep.subr.bf16.mxu1 %v3082_v1 }
 0x5df   : > { %2948 = vmatpush3.bf16.msra.mxu1 %v3062_v56  ;;  %v2158_v56 = vrot.slane %v2059_v33, %v3338_v25 }
 0x5e0   : > { %2949 = vmatprep.subr.bf16.mxu1 %v3082_v1 }
 0x5e3   : > { %2950 = vmatpush3.bf16.msra.mxu1 %v3064_v57 }
 0x5e4   : > { %2951 = vmatprep.subr.bf16.mxu1 %v3082_v1 }
 0x5e7   : > { %2952 = vmatpush3.bf16.msra.mxu1 %v3065_v58 }
 0x5e8   : > { %2953 = vmatprep.subr.bf16.mxu1 %v3082_v1 }
 0x5eb   : > { %2954 = vmatpush3.bf16.msra.mxu1 %v3066_v53 }
 0x5ec   : > { %2955 = vmatprep.subr.bf16.mxu1 %v3082_v1 }
 0x5ef   : > { %2956 = vmatpush3.bf16.msra.mxu1 %v3067_v51  ;;  %v2694_v51 = vld [vmem:[%s3965_s20 + $0xc] sm:$0x7] }
 0x5f0   : > { %2957 = vmatprep.subr.bf16.mxu1 %v3082_v1 }
 0x5f3   : > { %2958 = vmatpush3.bf16.msra.mxu1 %v3068_v15 }
 0x5f4   : > { %2959 = vmatprep.subr.bf16.mxu1 %v3082_v1  ;;  %v2057_v1 = vld [vmem:[%s3965_s20] sm:$0x7] }
 0x5f5   : > { %v2078_v62 = vrot.slane %v2057_v1, %v3335_v23  ;;  %v2068_v17 = vrot.slane %v2057_v1, %v3330_v21  ;;  %v2090_v3 = vrot.slane %v2057_v1, %v3338_v25  ;;  %v2215_v1 = vrot.slane %v2694_v51, %v3335_v23 }
 0x5f7   : > { %2960 = vmatpush3.bf16.msra.mxu1 %v3069_v60 }
 0x6ad   : > { %v2041_v38 = vpop.f32.mrb[12].mxu1 }
 0x6ae   : > { %v2054_v40 = vrot.slane %v2041_v38, %v3335_v23  ;;  %v2944_v41 = vpop.f32.mrb[13].mxu1  ;;  %v2134_v38 = vrot.slane %v2059_v33, %v3330_v21 }
 0x6b0   : > { %v3754_v6 = vmul.f32 %v2054_v40, %v2049_v36  ;;  %v3756_v42 = vmul.f32 %v2054_v40, %v2050_v28 }
 0x6b2   : > { %2061 = vst [vmem:[#allocation2 + $0x1] sm:$0xff] %v3754_v6  ;;  %2062 = vst [vmem:[#allocation2 + $0x9] sm:$0xff] %v3756_v42  ;;  %v2102_v27 = vmul.f32 %v2100_v49, %v3756_v42  ;;  %v2101_v29 = vmul.f32 %v2100_v49, %v3754_v6 }
 0x6b9   : > { %v3768_v46 = vld [vmem:[#allocation2 + $0x8] sm:$0xff]  ;;  %v3770_v18 = vld [vmem:[#allocation2] sm:$0xff] }
 0x6ba   : > { %v3772_v47 = vld [vmem:[#allocation2 + $0xa] sm:$0xff]  ;;  %2073 = vrot.lane.b32.xlu1 %v3768_v46, %s3999_s3  ;;  %2071 = vrot.lane.b32.xlu0 %v3770_v18, %s3999_s3  ;;  %v3778_v8 = vld [vmem:[#allocation2 + $0x2] sm:$0xff]  ;;  %v2070_v9 = vmul.f32 %v2068_v17, %v3768_v46  ;;  %v2069_v10 = vmul.f32 %v2068_v17, %v3770_v18 }
 0x6bb   : > { %2198 = vst [vmem:[#allocation2 + $0x1] sm:$0xff] %v3372_v39  ;;  %2199 = vst [vmem:[#allocation2 + $0x9] sm:$0xff] %v3379_v44  ;;  %v2136_v48 = vmul.f32 %v2134_v38, %v3772_v47  ;;  %v2135_v55 = vmul.f32 %v2134_v38, %v3778_v8 }
 0x6be   : > { %2085 = vrot.lane.b32.xlu1 %v3768_v46, %s3996_s28  ;;  %2083 = vrot.lane.b32.xlu0 %v3770_v18, %s3996_s28 }
 0x6c2   : > { %2107 = vrot.lane.b32.xlu1 %v3756_v42, %s3999_s3  ;;  %2105 = vrot.lane.b32.xlu0 %v3754_v6, %s3999_s3  ;;  %v3833_v59 = vld [vmem:[#allocation2 + $0x8] sm:$0xff]  ;;  %v3835_v2 = vld [vmem:[#allocation2] sm:$0xff] }
 0x6c3   : > { %v3869_v54 = vld [vmem:[#allocation2 + $0xa] sm:$0xff]  ;;  %v3871_v61 = vld [vmem:[#allocation2 + $0x2] sm:$0xff] }
 0x6c6   : > { %2119 = vrot.lane.b32.xlu1 %v3756_v42, %s3996_s28  ;;  %2117 = vrot.lane.b32.xlu0 %v3754_v6, %s3996_s28 }
 0x6ca   : > { %2141 = vrot.lane.b32.xlu1 %v3772_v47, %s3999_s3  ;;  %2139 = vrot.lane.b32.xlu0 %v3778_v8, %s3999_s3 }
 0x6ce   : > { %2153 = vrot.lane.b32.xlu1 %v3772_v47, %s3996_s28  ;;  %2151 = vrot.lane.b32.xlu0 %v3778_v8, %s3996_s28 }
 0x6d2   : > { %2210 = vrot.lane.b32.xlu1 %v3833_v59, %s3999_s3  ;;  %2208 = vrot.lane.b32.xlu0 %v3835_v2, %s3999_s3 }
 0x6d6   : > { %2222 = vrot.lane.b32.xlu1 %v3833_v59, %s3996_s28  ;;  %2220 = vrot.lane.b32.xlu0 %v3835_v2, %s3996_s28 }
 0x6da   : > { %2244 = vrot.lane.b32.xlu1 %v3379_v44, %s3999_s3  ;;  %2242 = vrot.lane.b32.xlu0 %v3372_v39, %s3999_s3 }
 0x6de   : > { %2256 = vrot.lane.b32.xlu1 %v3379_v44, %s3996_s28  ;;  %2254 = vrot.lane.b32.xlu0 %v3372_v39, %s3996_s28 }
 0x6e2   : > { %2278 = vrot.lane.b32.xlu1 %v3869_v54, %s3999_s3  ;;  %2276 = vrot.lane.b32.xlu0 %v3871_v61, %s3999_s3 }
 0x6e6   : > { %2290 = vrot.lane.b32.xlu1 %v3869_v54, %s3996_s28  ;;  %2288 = vrot.lane.b32.xlu0 %v3871_v61, %s3996_s28 }
 0x72c   : > { %v2074_v63 = vpop.permute.xlu1 %2073  ;;  %v2072_v0 = vpop.permute.xlu0 %2071 }
 0x72d   : > { %v2080_v7 = vmul.f32 %v2078_v62, %v2074_v63  ;;  %v2079_v16 = vmul.f32 %v2078_v62, %v2072_v0  ;;  %v2205_v63 = vrot.slane %v2694_v51, %v3330_v21  ;;  %v2693_v0 = vld [vmem:[%s3966_s21] ss:$0 sm:$0xff] }
 0x72f   : > { %v2082_v20 = vadd.f32 %v2080_v7, %v2070_v9  ;;  %v2081_v11 = vadd.f32 %v2079_v16, %v2069_v10  ;;  %v2695_v16 = vld [vmem:[%s3965_s20 + $0x10] sm:$0x7]  ;;  %v2227_v10 = vrot.slane %v2694_v51, %v3338_v25 }
 0x730   : > { %v2086_v12 = vpop.permute.xlu1 %2085  ;;  %v2084_v24 = vpop.permute.xlu0 %2083 }
 0x731   : > { %v2092_v50 = vmul.f32 %v2090_v3, %v2086_v12  ;;  %v2091_v22 = vmul.f32 %v2090_v3, %v2084_v24 }
 0x733   : > { %v2094_v26 = vadd.f32 %v2092_v50, %v2082_v20  ;;  %v2093_v13 = vadd.f32 %v2091_v22, %v2081_v11  ;;  %v2207_v20 = vmul.f32 %v2205_v63, %v3833_v59  ;;  %v2206_v11 = vmul.f32 %v2205_v63, %v3835_v2  ;;  %v2696_v2 = vld [vmem:[%s3965_s20 + $0x14] sm:$0x7] }
 0x734   : > { %v2108_v30 = vpop.permute.xlu1 %2107  ;;  %v2106_v31 = vpop.permute.xlu0 %2105  ;;  %v2237_v50 = vrot.slane %v2695_v16, %v3330_v21  ;;  %v2295_v51 = vrot.slane %v2696_v2, %v3338_v25 }
 0x735   : > { %v2104_v37 = vadd.f32 %v2102_v27, %v2094_v26  ;;  %v2114_v34 = vmul.f32 %v2112_v19, %v2108_v30  ;;  %v2103_v36 = vadd.f32 %v2101_v29, %v2093_v13  ;;  %v2113_v28 = vmul.f32 %v2112_v19, %v2106_v31 }
 0x736   : > { %v2249_v30 = vrot.slane %v2695_v16, %v3335_v23 }
 0x737   : > { %v2116_v42 = vadd.f32 %v2114_v34, %v2104_v37  ;;  %v2115_v6 = vadd.f32 %v2113_v28, %v2103_v36  ;;  %v2239_v34 = vmul.f32 %v2237_v50, %v3379_v44  ;;  %v2238_v36 = vmul.f32 %v2237_v50, %v3372_v39 }
 0x738   : > { %v2120_v40 = vpop.permute.xlu1 %2119  ;;  %v2118_v41 = vpop.permute.xlu0 %2117  ;;  %v2283_v39 = vrot.slane %v2696_v2, %v3335_v23 }
 0x739   : > { %v2126_v45 = vmul.f32 %v2124_v32, %v2120_v40  ;;  %v2125_v4 = vmul.f32 %v2124_v32, %v2118_v41  ;;  %v2261_v41 = vrot.slane %v2695_v16, %v3338_v25 }
 0x73b   : > { %v2128_v46 = vadd.f32 %v2126_v45, %v2116_v42  ;;  %v2127_v18 = vadd.f32 %v2125_v4, %v2115_v6  ;;  %v2271_v4 = vrot.slane %v2696_v2, %v3330_v21 }
 0x73c   : > { %v2142_v14 = vpop.permute.xlu1 %2141  ;;  %v2140_v5 = vpop.permute.xlu0 %2139 }
 0x73d   : > { %v2138_v35 = vadd.f32 %v2136_v48, %v2128_v46  ;;  %v2148_v57 = vmul.f32 %v2146_v43, %v2142_v14  ;;  %v2137_v58 = vadd.f32 %v2135_v55, %v2127_v18  ;;  %v2147_v53 = vmul.f32 %v2146_v43, %v2140_v5 }
 0x73e   : > { %v2273_v5 = vmul.f32 %v2271_v4, %v3869_v54  ;;  %v2698_v54 = vld [vmem:[%s3966_s21 + $0x1] ss:$0 sm:$0xff] }
 0x73f   : > { %v2150_v62 = vadd.f32 %v2148_v57, %v2138_v35  ;;  %v2149_v47 = vadd.f32 %v2147_v53, %v2137_v58 }
 0x740   : > { %v2154_v15 = vpop.permute.xlu1 %2153  ;;  %v2152_v60 = vpop.permute.xlu0 %2151 }
 0x741   : > { %v2160_v17 = vmul.f32 %v2158_v56, %v2154_v15  ;;  %v2159_v8 = vmul.f32 %v2158_v56, %v2152_v60  ;;  %v2272_v56 = vmul.f32 %v2271_v4, %v3871_v61 }
 0x743   : > { %v2162_v52 = vadd.f32 %v2160_v17, %v2150_v62  ;;  %v2161_v7 = vadd.f32 %v2159_v8, %v2149_v47 }
 0x744   : > { %v2211_v3 = vpop.permute.xlu1 %2210  ;;  %v2209_v9 = vpop.permute.xlu0 %2208 }
 0x745   : > { %v2170_v49 = vadd.f32 %v2693_v0, %v2162_v52  ;;  %v2169_v12 = vadd.f32 %v2693_v0, %v2161_v7  ;;  %v2217_v24 = vmul.f32 %v2215_v1, %v2211_v3  ;;  %v2216_v19 = vmul.f32 %v2215_v1, %v2209_v9 }
 0x747   : > { %v2172_v22 = vmax.f32 %v2170_v49, 0.0  ;;  %v2171_v26 = vmax.f32 %v2169_v12, 0.0  ;;  %v2219_v13 = vadd.f32 %v2217_v24, %v2207_v20  ;;  %v2218_v32 = vadd.f32 %v2216_v19, %v2206_v11  ;;  %v2731_v19 = vld [vmem:[%s3968_s23] ss:$0 sm:$0xff] }
 0x748   : > { %v2223_v27 = vpop.permute.xlu1 %2222  ;;  %v2221_v29 = vpop.permute.xlu0 %2220 }
 0x749   : > { %v2173_v31 = vpack.c.bf16 %v2172_v22, %v2171_v26  ;;  %v2229_v33 = vmul.f32 %v2227_v10, %v2223_v27  ;;  %v2228_v37 = vmul.f32 %v2227_v10, %v2221_v29 }
 0x74b   : > { %v2231_v59 = vadd.f32 %v2229_v33, %v2219_v13  ;;  %v2230_v28 = vadd.f32 %v2228_v37, %v2218_v32  ;;  %2982 = vmatmul.mubr.bf16.vlgmr.msra.gmra.mrb[12].mxu0 %v2173_v31 }
 0x74c   : > { %v2245_v38 = vpop.permute.xlu1 %2244  ;;  %v2243_v40 = vpop.permute.xlu0 %2242 }
 0x74d   : > { %v2241_v43 = vadd.f32 %v2239_v34, %v2231_v59  ;;  %v2251_v42 = vmul.f32 %v2249_v30, %v2245_v38  ;;  %v2240_v6 = vadd.f32 %v2238_v36, %v2230_v28  ;;  %v2250_v45 = vmul.f32 %v2249_v30, %v2243_v40 }
 0x74f   : > { %v2253_v18 = vadd.f32 %v2251_v42, %v2241_v43  ;;  %v2252_v48 = vadd.f32 %v2250_v45, %v2240_v6 }
 0x750   : > { %v2257_v44 = vpop.permute.xlu1 %2256  ;;  %v2255_v46 = vpop.permute.xlu0 %2254 }
 0x751   : > { %v2263_v55 = vmul.f32 %v2261_v41, %v2257_v44  ;;  %v2262_v14 = vmul.f32 %v2261_v41, %v2255_v46 }
 0x753   : > { %v2265_v35 = vadd.f32 %v2263_v55, %v2253_v18  ;;  %v2264_v57 = vadd.f32 %v2262_v14, %v2252_v48 }
 0x754   : > { %v2279_v58 = vpop.permute.xlu1 %2278  ;;  %v2277_v53 = vpop.permute.xlu0 %2276 }
 0x755   : > { %v2275_v15 = vadd.f32 %v2273_v5, %v2265_v35  ;;  %v2285_v21 = vmul.f32 %v2283_v39, %v2279_v58  ;;  %v2274_v60 = vadd.f32 %v2272_v56, %v2264_v57  ;;  %v2284_v1 = vmul.f32 %v2283_v39, %v2277_v53 }
 0x757   : > { %v2287_v47 = vadd.f32 %v2285_v21, %v2275_v15  ;;  %v2286_v17 = vadd.f32 %v2284_v1, %v2274_v60 }
 0x758   : > { %v2291_v62 = vpop.permute.xlu1 %2290  ;;  %v2289_v23 = vpop.permute.xlu0 %2288 }
 0x759   : > { %v2297_v8 = vmul.f32 %v2295_v51, %v2291_v62  ;;  %v2296_v63 = vmul.f32 %v2295_v51, %v2289_v23 }
 0x75b   : > { %v2299_v61 = vadd.f32 %v2297_v8, %v2287_v47  ;;  %v2298_v0 = vadd.f32 %v2296_v63, %v2286_v17 }
 0x75d   : > { %v2307_v52 = vadd.f32 %v2698_v54, %v2299_v61  ;;  %v2306_v7 = vadd.f32 %v2698_v54, %v2298_v0 }
 0x75f   : > { %v2309_v16 = vmax.f32 %v2307_v52, 0.0  ;;  %v2308_v25 = vmax.f32 %v2306_v7, 0.0 }
 0x761   : > { %v2310_v3 = vpack.c.bf16 %v2309_v16, %v2308_v25 }
 0x763   : > { %2962 = vmatmul.mubr.bf16.vlgmr.msra.gmra.mrb[16].mxu1 %v2310_v3 }
 0x81e   : > { %v2499_v9 = vpop.f32.mrb[12].mxu0 }
 0x81f   : > { %v2983_v10 = vpop.f32.mrb[13].mxu0 }
 0x820   : > { %v2502_v49 = vpop.f32.mrb[14].mxu0 }
 0x821   : > { %v2984_v12 = vpop.f32.mrb[15].mxu0 }
 0x836   : > { %v2410_v24 = vpop.f32.mrb[16].mxu1 }
 0x837   : > { %v2500_v20 = vadd.f32 %v2499_v9, %v2410_v24  ;;  %v2963_v11 = vpop.f32.mrb[17].mxu1 }
 0x838   : > { %v2413_v50 = vpop.f32.mrb[18].mxu1 }
 0x839   : > { %v2513_v22 = vadd.f32 %v2731_v19, %v2500_v20  ;;  %v2503_v26 = vadd.f32 %v2502_v49, %v2413_v50  ;;  %v2964_v13 = vpop.f32.mrb[19].mxu1 }
 0x83b   : > { %v2515_v27 = vmax.f32 %v2513_v22, 0.0  ;;  %v2514_v29 = vadd.f32 %v2731_v19, %v2503_v26 }
 0x83d   : > { %2517 = vst [vmem:[%s777_s29] sm:$0xff] %v2515_v27  ;;  %v2516_v30 = vmax.f32 %v2514_v29, 0.0 }
 0x83f   : > { %2518 = vst [vmem:[%s777_s29 + $0x8] sm:$0xff] %v2516_v30 }
 0x840 PF: > { %s34_s5 = sadd.s32 1, %s3080_s5  }
 0x841   : > { %p31_p4 = scmp.ge.s32.totalorder %s34_s5, 4  }
 0x843   :  { %33 = sbr.rel (!%p31_p4) target bundleno = 10 (0xa), region = 161 }

</bundles_post_ra>
